<compile_context>
chip_gen: v6e
topology: v6e:2x2x1
jax: 0.10.0
libtpu: 0.0.40
codegen_flags: <defaults>
</compile_context>

<pallas_src>
import numpy as np
import jax
import jax.numpy as jnp
from jax import lax
from jax.experimental import pallas as pl
from jax.experimental.pallas import tpu as pltpu

OUTPUTSCALE = 1.0
LENGTHSCALE = 1.5

DENSITY_DENOM = 0.0482 * 2
HVAP_DENOM = 25.683
HMIX_DENOM = 1.594


def _round_up(n, m):
    return ((n + m - 1) // m) * m


def _force_balance_kernel(x_ref, xtr_ref, w_ref, mw_ref, out_ref, kk_ref):
    """Fused surrogate-evaluation + objective kernel, batch-on-lanes layout.

    x_ref:   [Dp, tb]   candidate params transposed; row D is ones, rows D+1.. zero
    xtr_ref: [PN, Dp]   cols 0:D = -2*Xtr, col D = ||Xtr||^2, rest zero   (resident)
    w_ref:   [2P, 2PN]  bf16 stacked block-diagonal GP weights:
                        rows 0:P -> alpha acting on k, rows P:2P -> beta acting on k^2
    mw_ref:  [2P, 1]    rows 0:P measurements, rows P:2P = 1/(n_g * denom_g^2)
    out_ref: [3P, tb]   rows 0:P mean, P:2P variance, 2P:3P objective (broadcast)
    kk_ref:  [2PN, tb]  bf16 VMEM scratch holding [k ; k*k]
    """
    PN = xtr_ref.shape[0]
    P = mw_ref.shape[0] // 2

    x = x_ref[...]                                                     # [Dp, tb]

    # ||Xtr||^2 - 2 * Xtr . x  via one augmented matmul.  Kept f32 / HIGHEST so the
    # expanded squared distance does not suffer bf16 cancellation near zero.
    d_part = jnp.dot(xtr_ref[...], x,
                     precision=lax.Precision.HIGHEST,
                     preferred_element_type=jnp.float32)               # [PN, tb]
    # ||x||^2 per batch lane; the ones-row contributes exactly 1, padding rows 0.
    x_sq = jnp.sum(x * x, axis=0, keepdims=True) - 1.0                 # [1, tb]
    sqdist = jnp.maximum(d_part + x_sq, 0.0)                           # [PN, tb]

    k = OUTPUTSCALE * jnp.exp((-0.5 / (LENGTHSCALE * LENGTHSCALE)) * sqdist)

    # Stage [k ; k^2] as bf16 in VMEM: bounds the live f32 vregs (no spills) and
    # provides a single-pass bf16 MXU operand for the fused mean/variance matmul.
    kk_ref[0:PN, :] = k.astype(jnp.bfloat16)
    kk_ref[PN:2 * PN, :] = (k * k).astype(jnp.bfloat16)

    mv = jnp.dot(w_ref[...], kk_ref[...],
                 preferred_element_type=jnp.float32)                   # [2P, tb]
    mean = mv[0:P, :]
    # clamp: a true GP posterior variance is non-negative
    var = jnp.maximum(OUTPUTSCALE - mv[P:2 * P, :], 0.0)

    meas = mw_ref[0:P, :]                                              # [P, 1]
    w = mw_ref[P:2 * P, :]                                             # [P, 1]
    resid = meas - mean                                                # [P, tb]
    # weighted SSE == sum_g 1/n_g * sum_{p in g} ((meas - pred)/denom_g)^2
    obj = jnp.sum(w * resid * resid, axis=0, keepdims=True)            # [1, tb]

    # Single lane-dense, full-width store (unmasked vst).
    out_ref[...] = jnp.concatenate(
        [mean, var, jnp.broadcast_to(obj, (P, mean.shape[1]))], axis=0)


def prepare_surrogate(xtr, alpha, beta, measurements, weights):
    """One-time host-side repack of the synthetic GP surrogate data.

    xtr: [P, N, D], alpha/beta: [P, N], measurements/weights: [P, 1] or [P].
    Returns (xtr_aug [PN, Dp] f32, w_stacked [2P, 2PN] bf16, mw [2P, 1] f32, D).
    """
    xtr = jnp.asarray(xtr, jnp.float32)
    alpha = jnp.asarray(alpha, jnp.float32)
    beta = jnp.asarray(beta, jnp.float32)
    P, N, D = xtr.shape
    PN = P * N
    Dp = _round_up(D + 1, 8)          # params + 1 column for ||Xtr||^2, sublane aligned

    xtr_flat = xtr.reshape(PN, D)                                      # row j = p*N + n
    xtr_sq = jnp.sum(xtr_flat * xtr_flat, axis=1, keepdims=True)       # [PN, 1]
    xtr_aug = jnp.concatenate(
        [-2.0 * xtr_flat, xtr_sq, jnp.zeros((PN, Dp - D - 1), jnp.float32)],
        axis=1)                                                        # [PN, Dp]

    prop_ids = jnp.repeat(jnp.arange(P), N)                            # [PN]
    onehot = (jnp.arange(P)[:, None] == prop_ids[None, :]).astype(jnp.float32)
    alpha_w = onehot * alpha.reshape(1, PN)                            # [P, PN]
    beta_w = onehot * beta.reshape(1, PN)
    zeros = jnp.zeros((P, PN), jnp.float32)
    w_stacked = jnp.concatenate(
        [jnp.concatenate([alpha_w, zeros], axis=1),    # acts on k   -> mean
         jnp.concatenate([zeros, beta_w], axis=1)],    # acts on k^2 -> variance
        axis=0).astype(jnp.bfloat16)                                   # [2P, 2PN]

    mw = jnp.concatenate(
        [jnp.asarray(measurements, jnp.float32).reshape(P, 1),
         jnp.asarray(weights, jnp.float32).reshape(P, 1)], axis=0)     # [2P, 1]
    return xtr_aug, w_stacked, mw, D


def force_balance_objective(parameters, surrogate, *, tb=128):
    """Batched equivalent of ForceBalanceObjectiveFunction.forward.

    parameters: [D] (single candidate, mirrors the torch forward) or [B, D].
    Returns (objective, mean, variance); objective is scalar for a single row.
    """
    xtr_aug, w_stacked, mw, D = surrogate
    PN, Dp = xtr_aug.shape
    P = mw.shape[0] // 2

    x = jnp.asarray(parameters, jnp.float32)
    single = (x.ndim == 1)
    if single:
        x = x[None, :]                    # .unsqueeze(-1).T equivalent
    B = x.shape[0]

    # Batch lives on the LANE axis -> tile must be a multiple of 128.
    tb = max(128, _round_up(tb, 128))
    if B >= 256:
        # Keep >= 2 grid steps so both v7x TensorCores get a tile (parallel axis).
        tb = min(tb, _round_up(-(-B // 2), 128))
    Bp = _round_up(B, tb)

    # x^T padded/augmented: rows 0:D params, row D ones (picks up ||Xtr||^2 in the
    # cross matmul), remaining rows zero -> every block is lane-dense.
    x_aug = jnp.zeros((Dp, Bp), jnp.float32)
    x_aug = x_aug.at[:D, :B].set(x.T)
    x_aug = x_aug.at[D, :].set(1.0)

    cost = pl.CostEstimate(
        flops=int(Bp * (2 * PN * Dp + 2 * (2 * PN) * (2 * P) + 12 * PN)),
        transcendentals=int(Bp * PN),
        bytes_accessed=int(4 * (Dp * Bp + 3 * P * Bp + xtr_aug.size + mw.size)
                           + 2 * w_stacked.size),
    )

    out = pl.pallas_call(
        _force_balance_kernel,
        grid=(Bp // tb,),
        in_specs=[
            pl.BlockSpec((Dp, tb), lambda i: (0, i)),          # candidate tile (lanes)
            pl.BlockSpec((PN, Dp), lambda i: (0, 0),           # resident, single-buffered
                         pipeline_mode=pl.Buffered(1)),
            pl.BlockSpec((2 * P, 2 * PN), lambda i: (0, 0),
                         pipeline_mode=pl.Buffered(1)),
            pl.BlockSpec((2 * P, 1), lambda i: (0, 0),
                         pipeline_mode=pl.Buffered(1)),
        ],
        out_specs=pl.BlockSpec((3 * P, tb), lambda i: (0, i)),
        out_shape=jax.ShapeDtypeStruct((3 * P, Bp), jnp.float32),
        scratch_shapes=[pltpu.VMEM((2 * PN, tb), jnp.bfloat16)],
        compiler_params=pltpu.CompilerParams(
            dimension_semantics=("parallel",)),                # both TCs on v7x
        cost_estimate=cost,
    )(x_aug, xtr_aug, w_stacked, mw)

    mean = out[0:P, :B].T
    var = out[P:2 * P, :B].T
    obj = out[2 * P, :B]
    if single:
        return obj[0], mean[0], var[0]
    return obj, mean, var


def _group_indices(property_labels):
    density = [i for i, l in enumerate(property_labels) if l.endswith("Density")]
    hvap = [i for i, l in enumerate(property_labels) if l.endswith("EnthalpyOfVaporization")]
    hmix = [i for i, l in enumerate(property_labels) if l.endswith("EnthalpyOfMixing")]
    return density, hvap, hmix


def _make_weights(property_labels):
    P = len(property_labels)
    density, hvap, hmix = _group_indices(property_labels)
    w = np.zeros((P, 1), np.float32)
    if density:
        w[np.asarray(density), 0] = 1.0 / (len(density) * DENSITY_DENOM ** 2)
    if hvap:
        w[np.asarray(hvap), 0] = 1.0 / (len(hvap) * HVAP_DENOM ** 2)
    if hmix:
        w[np.asarray(hmix), 0] = 1.0 / (len(hmix) * HMIX_DENOM ** 2)
    return jnp.asarray(w)


if __name__ == "__main__":
    # Deterministic synthetic setup:
    #   4 LJ parameter types x (epsilon, rmin_half) -> D = 8 flat parameters
    #   8 target properties: 3 Density, 3 EnthalpyOfVaporization, 2 EnthalpyOfMixing
    #   32 GP training points per property surrogate, 256 candidate rows.
    D, N, B = 8, 32, 256
    property_labels = [
        "x=0.0/Density", "x=0.5/Density", "x=1.0/Density",
        "x=0.0/EnthalpyOfVaporization", "x=0.5/EnthalpyOfVaporization",
        "x=1.0/EnthalpyOfVaporization",
        "x=0.25/EnthalpyOfMixing", "x=0.75/EnthalpyOfMixing",
    ]
    P = len(property_labels)

    key = jax.random.PRNGKey(0)
    k_params, k_xtr, k_alpha, k_beta, k_meas = jax.random.split(key, 5)
    params_batch = jax.random.uniform(k_params, (B, D), jnp.float32, 0.1, 1.0)
    xtr = jax.random.normal(k_xtr, (P, N, D), jnp.float32)
    alpha = 0.1 * jax.random.normal(k_alpha, (P, N), jnp.float32)
    beta = 0.01 * jnp.abs(jax.random.normal(k_beta, (P, N), jnp.float32))
    measurements = jax.random.uniform(k_meas, (P, 1), jnp.float32, 0.5, 1.5)
    weights = _make_weights(property_labels)

    # TODO(synk): gpytorch fast_pred_var / eval_cg_tolerance posterior caches have no
    # Pallas equivalent; the surrogate is a synthetic deterministic RBF-GP posterior.
    surrogate = prepare_surrogate(xtr, alpha, beta, measurements, weights)

    # Batched evaluation (optimizer inner loop) + single-row path (module forward).
    obj, mean, var = force_balance_objective(params_batch, surrogate)
    obj = jax.block_until_ready(obj)
    obj0, mean0, var0 = force_balance_objective(params_batch[0], surrogate)
    obj0 = jax.block_until_ready(obj0)

    # Pure-numpy reference of the exact forward semantics (group-wise objective).
    x_np = np.asarray(params_batch)                                    # [B, D]
    sq = np.sum((np.asarray(xtr)[None] - x_np[:, None, None, :]) ** 2, axis=-1)
    k_np = OUTPUTSCALE * np.exp(-0.5 * sq / (LENGTHSCALE ** 2))        # [B, P, N]
    mean_ref = np.sum(k_np * np.asarray(alpha)[None], axis=-1)         # [B, P]
    var_ref = np.maximum(
        OUTPUTSCALE - np.sum(k_np ** 2 * np.asarray(beta)[None], axis=-1), 0.0)

    density, hvap, hmix = _group_indices(property_labels)
    meas_np = np.asarray(measurements)[:, 0]
    obj_ref = np.zeros(B, np.float64)
    for idx, denom in ((density, DENSITY_DENOM), (hvap, HVAP_DENOM), (hmix, HMIX_DENOM)):
        if idx:
            pred = mean_ref[:, np.asarray(idx)]
            meas = meas_np[np.asarray(idx)]
            obj_ref += (1.0 / len(idx)) * np.sum(((meas - pred) / denom) ** 2, axis=-1)

    # Tolerances cover the bf16 MXU reduction path.
    assert np.allclose(np.asarray(mean), mean_ref, rtol=1e-2, atol=1e-3), "mean mismatch"
    assert np.allclose(np.asarray(var), var_ref, rtol=1e-2, atol=1e-3), "var mismatch"
    assert np.allclose(np.asarray(obj), obj_ref, rtol=1e-2, atol=1e-3), "objective mismatch"
    assert np.allclose(float(obj0), obj_ref[0], rtol=1e-2, atol=1e-3), "single-row mismatch"

    print("KERNEL_OK")
</pallas_src>

<mosaic_0001>
module attributes {stable_mosaic.version = 11 : i64} {
  func.func @_force_balance_kernel(%arg0: i32, %arg1: memref<16x128xf32, #tpu.memory_space<vmem>>, %arg2: memref<256x16xf32, #tpu.memory_space<vmem>>, %arg3: memref<16x512xbf16, #tpu.memory_space<vmem>>, %arg4: memref<16x1xf32, #tpu.memory_space<vmem>>, %arg5: memref<24x128xf32, #tpu.memory_space<vmem>>, %arg6: memref<512x128xbf16, #tpu.memory_space<vmem>>) attributes {dimension_semantics = [#tpu.dimension_semantics<parallel>], iteration_bounds = array<i64: 2>, scalar_prefetch = 0 : i64, scratch_operands = 1 : i64, tpu.core_type = #tpu.core_type<tc>, window_params = [{transform_indices = @transform_0, window_bounds = array<i64: 16, 128>}, {pipeline_mode = #tpu.pipeline_mode<synchronous>, transform_indices = @transform_1, window_bounds = array<i64: 256, 16>}, {pipeline_mode = #tpu.pipeline_mode<synchronous>, transform_indices = @transform_2, window_bounds = array<i64: 16, 512>}, {pipeline_mode = #tpu.pipeline_mode<synchronous>, transform_indices = @transform_3, window_bounds = array<i64: 16, 1>}, {transform_indices = @transform_4, window_bounds = array<i64: 24, 128>}]} {
    %c0 = arith.constant 0 : index
    %c0_0 = arith.constant 0 : index
    %0 = vector.load %arg1[%c0, %c0_0] : memref<16x128xf32, #tpu.memory_space<vmem>>, vector<16x128xf32>
    %c0_1 = arith.constant 0 : index
    %c0_2 = arith.constant 0 : index
    %1 = vector.load %arg2[%c0_1, %c0_2] : memref<256x16xf32, #tpu.memory_space<vmem>>, vector<256x16xf32>
    %cst = arith.constant dense<0.000000e+00> : vector<256x128xf32>
    %2 = tpu.matmul %1, %0, %cst {dimension_numbers = #tpu.dot_dimension_numbers<[1], [0], [0], [1], [0, 0, 1, 1], [], []>, precision = #tpu.contract_precision<fp32>} : vector<256x16xf32>, vector<16x128xf32>, vector<256x128xf32> -> vector<256x128xf32>
    %3 = arith.mulf %0, %0 : vector<16x128xf32>
    %cst_3 = arith.constant dense<0.000000e+00> : vector<128xf32>
    %4 = vector.multi_reduction <add>, %3, %cst_3 [0] : vector<16x128xf32> to vector<128xf32>
    %5 = vector.shape_cast %4 : vector<128xf32> to vector<1x128xf32>
    %cst_4 = arith.constant 1.000000e+00 : f32
    %6 = vector.broadcast %cst_4 : f32 to vector<1x128xf32>
    %7 = arith.subf %5, %6 : vector<1x128xf32>
    %8 = vector.broadcast %7 : vector<1x128xf32> to vector<256x128xf32>
    %9 = arith.addf %2, %8 : vector<256x128xf32>
    %cst_5 = arith.constant 0.000000e+00 : f32
    %10 = vector.broadcast %cst_5 : f32 to vector<256x128xf32>
    %11 = arith.maximumf %9, %10 : vector<256x128xf32>
    %cst_6 = arith.constant -0.222222224 : f32
    %12 = vector.broadcast %cst_6 : f32 to vector<256x128xf32>
    %13 = arith.mulf %12, %11 : vector<256x128xf32>
    %14 = math.exp %13 : vector<256x128xf32>
    %cst_7 = arith.constant 1.000000e+00 : f32
    %15 = vector.broadcast %cst_7 : f32 to vector<256x128xf32>
    %16 = arith.mulf %15, %14 : vector<256x128xf32>
    %17 = arith.truncf %16 : vector<256x128xf32> to vector<256x128xbf16>
    %c0_8 = arith.constant 0 : index
    %c0_9 = arith.constant 0 : index
    %18 = vector.load %arg6[%c0_8, %c0_9] : memref<512x128xbf16, #tpu.memory_space<vmem>>, vector<256x128xbf16>
    tpu.vector_store %arg6[%c0_8, %c0_9], %17 {strides = array<i32>} : memref<512x128xbf16, #tpu.memory_space<vmem>>, vector<256x128xbf16>,
    %19 = arith.mulf %16, %16 : vector<256x128xf32>
    %20 = arith.truncf %19 : vector<256x128xf32> to vector<256x128xbf16>
    %c256 = arith.constant 256 : index
    %c0_10 = arith.constant 0 : index
    %21 = vector.load %arg6[%c256, %c0_10] : memref<512x128xbf16, #tpu.memory_space<vmem>>, vector<256x128xbf16>
    tpu.vector_store %arg6[%c256, %c0_10], %20 {strides = array<i32>} : memref<512x128xbf16, #tpu.memory_space<vmem>>, vector<256x128xbf16>,
    %c0_11 = arith.constant 0 : index
    %c0_12 = arith.constant 0 : index
    %22 = vector.load %arg3[%c0_11, %c0_12] : memref<16x512xbf16, #tpu.memory_space<vmem>>, vector<16x512xbf16>
    %c0_13 = arith.constant 0 : index
    %c0_14 = arith.constant 0 : index
    %23 = vector.load %arg6[%c0_13, %c0_14] : memref<512x128xbf16, #tpu.memory_space<vmem>>, vector<512x128xbf16>
    %cst_15 = arith.constant dense<0.000000e+00> : vector<16x128xf32>
    %24 = tpu.matmul %22, %23, %cst_15 {dimension_numbers = #tpu.dot_dimension_numbers<[1], [0], [0], [1], [0, 0, 1, 1], [], []>} : vector<16x512xbf16>, vector<512x128xbf16>, vector<16x128xf32> -> vector<16x128xf32>
    %25 = vector.extract_strided_slice %24 {offsets = [0, 0], sizes = [8, 128], strides = [1, 1]} : vector<16x128xf32> to vector<8x128xf32>
    %26 = vector.extract_strided_slice %24 {offsets = [8, 0], sizes = [8, 128], strides = [1, 1]} : vector<16x128xf32> to vector<8x128xf32>
    %cst_16 = arith.constant 1.000000e+00 : f32
    %27 = vector.broadcast %cst_16 : f32 to vector<8x128xf32>
    %28 = arith.subf %27, %26 : vector<8x128xf32>
    %cst_17 = arith.constant 0.000000e+00 : f32
    %29 = vector.broadcast %cst_17 : f32 to vector<8x128xf32>
    %30 = arith.maximumf %28, %29 : vector<8x128xf32>
    %c0_18 = arith.constant 0 : index
    %c0_19 = arith.constant 0 : index
    %31 = vector.load %arg4[%c0_18, %c0_19] : memref<16x1xf32, #tpu.memory_space<vmem>>, vector<8x1xf32>
    %c8 = arith.constant 8 : index
    %c0_20 = arith.constant 0 : index
    %32 = vector.load %arg4[%c8, %c0_20] : memref<16x1xf32, #tpu.memory_space<vmem>>, vector<8x1xf32>
    %33 = vector.broadcast %31 : vector<8x1xf32> to vector<8x128xf32>
    %34 = arith.subf %33, %25 : vector<8x128xf32>
    %35 = vector.broadcast %32 : vector<8x1xf32> to vector<8x128xf32>
    %36 = arith.mulf %35, %34 : vector<8x128xf32>
    %37 = arith.mulf %36, %34 : vector<8x128xf32>
    %cst_21 = arith.constant dense<0.000000e+00> : vector<128xf32>
    %38 = vector.multi_reduction <add>, %37, %cst_21 [0] : vector<8x128xf32> to vector<128xf32>
    %39 = vector.shape_cast %38 : vector<128xf32> to vector<1x128xf32>
    %40 = vector.shape_cast %39 : vector<1x128xf32> to vector<1x128xf32>
    %41 = vector.broadcast %40 : vector<1x128xf32> to vector<8x128xf32>
    %42 = tpu.concatenate %25, %30, %41 in 0 : vector<8x128xf32>, vector<8x128xf32>, vector<8x128xf32> -> vector<24x128xf32>
    %c0_22 = arith.constant 0 : index
    %c0_23 = arith.constant 0 : index
    %43 = vector.load %arg5[%c0_22, %c0_23] : memref<24x128xf32, #tpu.memory_space<vmem>>, vector<24x128xf32>
    tpu.vector_store %arg5[%c0_22, %c0_23], %42 {strides = array<i32>} : memref<24x128xf32, #tpu.memory_space<vmem>>, vector<24x128xf32>,
    return
  }
  func.func @transform_0(%arg0: i32) -> (i32, i32) {
    %c0_i32 = arith.constant 0 : i32
    %c0_i32_0 = arith.constant 0 : i32
    return %c0_i32, %arg0 : i32, i32
  }
  func.func @transform_1(%arg0: i32) -> (i32, i32) {
    %c0_i32 = arith.constant 0 : i32
    %c0_i32_0 = arith.constant 0 : i32
    %c0_i32_1 = arith.constant 0 : i32
    return %c0_i32, %c0_i32_0 : i32, i32
  }
  func.func @transform_2(%arg0: i32) -> (i32, i32) {
    %c0_i32 = arith.constant 0 : i32
    %c0_i32_0 = arith.constant 0 : i32
    %c0_i32_1 = arith.constant 0 : i32
    return %c0_i32, %c0_i32_0 : i32, i32
  }
  func.func @transform_3(%arg0: i32) -> (i32, i32) {
    %c0_i32 = arith.constant 0 : i32
    %c0_i32_0 = arith.constant 0 : i32
    %c0_i32_1 = arith.constant 0 : i32
    return %c0_i32, %c0_i32_0 : i32, i32
  }
  func.func @transform_4(%arg0: i32) -> (i32, i32) {
    %c0_i32 = arith.constant 0 : i32
    %c0_i32_0 = arith.constant 0 : i32
    return %c0_i32, %arg0 : i32, i32
  }
}

</mosaic_0001>

<bundles_post_ra>
// kernel: tpu_custom_call.1
= control target key start
LH: loop header
LB: loop body
LE: loop exit
PB: predicated region body
PF: predicated region fallthrough
CT: control target
= control target key end

     0   :  { %9 = vsyncpa [#allocation5], 0  ;;  %s5440_s0 = inlined_call_operand.vmem [shape: f32[16,256], index: 0, kind: input, shape index: {}]   ;;  %s5441_s1 = inlined_call_operand.vmem [shape: f32[256,16], index: 1, kind: input, shape index: {}]   ;;  %s5442_s2 = inlined_call_operand.vmem [shape: bf16[16,512], index: 2, kind: input, shape index: {}]   ;;  %s5443_s3 = inlined_call_operand.vmem [shape: f32[16,1], index: 3, kind: input, shape index: {}]   ;;  %s5444_s4 = inlined_call_operand.hbm [shape: f32[24,256], index: 4, kind: output, shape index: {}]  }
   0x1   :  { %11 = vsyncpa [#allocation5 + $0x1], 0  ;;  %s4283_s15 = smov 0   ;;  %s4285_s16 = smov 0  }
   0x2   :  { %s4287_s17 = smov 0   ;;  %s4289_s18 = smov 0  }
   0x3 LB: > { %s3117_s19 = sadd.s32 4294967295, %s4251_s18   ;;  %s3118_s20 = sadd.s32 4294967294, %s4251_s18   ;;  %s4251_s18 = sphi %s4289_s18, %s5637_s18   ;;  %s4247_s17 = sphi %s4287_s17, %s5636_s17   ;;  %s4243_s16 = sphi %s4285_s16, %s5635_s16   ;;  %s4239_s15 = sphi %s4283_s15, %s5634_s15  }
   0x4   : > { %s4306_s21 = sadd.s32 1, %s4251_s18   ;;  %s24_s22 = sadd.s32 1, %s4247_s17 }
   0x5   : > { %s21_s23 = ssub.s32 %s4251_s18, %s4306_s21  ;;  %p31_p0 = scmp.ne.s32.totalorder %s4247_s17, %s4243_s16 }
   0x6   : > { %p22_p1 = scmp.eq.s32.totalorder %s21_s23, 0  ;;  %p32_p2 = scmp.eq.s32.totalorder %s4251_s18, 0 }
   0x7   : > { %p124_p3 = scmp.eq.s32.totalorder %s3117_s19, 1  ;;  %p129_p4 = scmp.ne.s32.totalorder %s4243_s16, %s4239_s15 }
   0x8   : > { %s4319_s24 = scalar_select %p22_p1, %s4247_s17, %s24_s22  }
   0x9   : > { %p33_p5 = por %p32_p2, %p31_p0  ;;  %p4321_p6 = por %p124_p3, %p31_p0 }
   0xa   : > { %p130_p7 = scmp.eq.s32.totalorder %s3118_s20, 1  ;;  %p3120_p9 = scmp.ge.s32.totalorder %s4251_s18, 2 }
   0xc   : > { %p4325_p8 = por %p130_p7, %p129_p4  ;;  %155 = sbr.rel (%p3120_p9) target bundleno = 22 (0x16), region = 28 }
  0x11   : > { %158 = sbr.rel (!%p33_p5) target bundleno = 22 (0x16), region = 32  ;;  %s160_s27 = sand.u32 (%p33_p5), 1, %s4247_s17  }
  0x12   : > { %s3122_s28 = sshll.u32 (%p33_p5), %s4251_s18, 3  ;;  %s3121_s29 = sshll.u32 (%p33_p5), %s160_s27, 4 }
  0x13   : > { %s164_s6 = scalar_lea.vmem (%p33_p5), %s5440_s0, %s3122_s28  ;;  %s162_s7 = scalar_lea.vmem (%p33_p5), [#allocation3], %s3121_s29 }
  0x14   : > { %v195_v0 = vld [vmem:[%s164_s6] sm:$0xff] (%p33_p5)  ;;  %v197_v1 = vld [vmem:[%s164_s6 + $0x10] sm:$0xff] (%p33_p5) }
  0x15   : > { %196 = vst [vmem:[%s162_s7] sm:$0xff] (%p33_p5), %v195_v0  ;;  %198 = vst [vmem:[%s162_s7 + $0x8] sm:$0xff] (%p33_p5), %v197_v1 }
  0x16 PF: > { %p3123_p10 = scmp.ge.s32.totalorder %s4251_s18, 1  ;;  %p203_p11 = scmp.lt.s32.totalorder %s4251_s18, 3 }
  0x18   : > { %p204_p12 = pnand %p3123_p10, %p203_p11 }
  0x1a   : > { %207 = sbr.rel (%p204_p12) target bundleno = 731 (0x2db), region = 70 }
  0x1f   : > { %s4340_s8 = sand.u32 1, %s4243_s16   ;;  %v238_v2 = vld [vmem:[%s5441_s1] sm:$0xff]  ;;  %vm280_vm0 = vcmask 130048   ;;  %v239_v3 = vld [vmem:[%s5441_s1 + $0x8] sm:$0xff]  ;;  %v240_v4 = vld [vmem:[%s5441_s1 + $0x10] sm:$0xff]  ;;  %s3226_s10 = sshll.u32 %s3117_s19, 7 }
  0x20   : > { %s3124_s20 = sshll.u32 %s4340_s8, 4  ;;  %v282_v5 = vsel %vm280_vm0, %v238_v2, 0  ;;  %v285_v6 = vsel %vm280_vm0, %v239_v3, 0  ;;  %v288_v7 = vsel %vm280_vm0, %v240_v4, 0  ;;  %v241_v8 = vld [vmem:[%s5441_s1 + $0x18] sm:$0xff]  ;;  %v242_v9 = vld [vmem:[%s5441_s1 + $0x20] sm:$0xff]  ;;  %s5397_s13 = scalar_lea.hbm %s5444_s4, %s3226_s10 }
  0x21   : > { %v4361_v10 = vand.u32 4294901760, %v282_v5  ;;  %v4363_v11 = vand.u32 4294901760, %v285_v6  ;;  %v4365_v12 = vand.u32 4294901760, %v288_v7  ;;  %v291_v13 = vsel %vm280_vm0, %v241_v8, 0  ;;  %s212_s29 = scalar_lea.vmem [#allocation3], %s3124_s20  ;;  %v243_v30 = vld [vmem:[%s5441_s1 + $0x28] sm:$0xff] }
  0x22   : > { %v237_v14 = vld [vmem:[%s212_s29 + $0x8] sm:$0xff]  ;;  %v236_v15 = vld [vmem:[%s212_s29] sm:$0xff]  ;;  %v4368_v16 = vand.u32 4294901760, %v291_v13  ;;  %v294_v17 = vsel %vm280_vm0, %v242_v9, 0  ;;  %v297_v41 = vsel %vm280_vm0, %v243_v30, 0  ;;  %s4044_s6 = smul.u32 24, %s4340_s8 }
  0x23   : > { %v271_v18 = vmul.f32 %v237_v14, %v237_v14  ;;  %v4371_v19 = vand.u32 4294901760, %v237_v14  ;;  %v270_v20 = vmul.f32 %v236_v15, %v236_v15  ;;  %v4373_v21 = vand.u32 4294901760, %v236_v15  ;;  %3788 = vmatprep.mubr.f32.mxu1 %v4361_v10  ;;  %v244_v46 = vld [vmem:[%s5441_s1 + $0x30] sm:$0xff]  ;;  %v245_v47 = vld [vmem:[%s5441_s1 + $0x38] sm:$0xff]  ;;  %v246_v48 = vld [vmem:[%s5441_s1 + $0x40] sm:$0xff]  ;;  %s3038_s14 = scalar_lea.sflag [#allocation5], %s4340_s8 }
  0x24   : > { %5500 = vst [vmem:[#allocation7_spill] sm:$0xff] %v4368_v16  ;;  %v4377_v22 = vsub.f32 %v282_v5, %v4361_v10  ;;  %v4380_v23 = vsub.f32 %v285_v6, %v4363_v11  ;;  %v4383_v24 = vsub.f32 %v288_v7, %v4365_v12  ;;  %v4386_v25 = vsub.f32 %v291_v13, %v4368_v16  ;;  %v247_v55 = vld [vmem:[%s5441_s1 + $0x48] sm:$0xff]  ;;  %v248_v56 = vld [vmem:[%s5441_s1 + $0x50] sm:$0xff]  ;;  %v249_v57 = vld [vmem:[%s5441_s1 + $0x58] sm:$0xff]  ;;  %s234_s7 = scalar_lea.vmem [#allocation4], %s4044_s6  ;;  %s4254_s19 = smov [#allocation4]  }
  0x25   : > { %3732 = vmatprep.subr.mxu0 %v4371_v19  ;;  %v4389_v26 = vadd.f32 %v271_v18, %v270_v20  ;;  %v794_v27 = vsub.f32 %v237_v14, %v4371_v19  ;;  %v4393_v28 = vsub.f32 %v236_v15, %v4373_v21  ;;  %v4395_v29 = vand.u32 4294901760, %v294_v17  ;;  %s3050_s9 = sshll.u32 %s234_s7, 4  ;;  %s4195_s22 = sshll.u32 %s4254_s19, 4  ;;  %s5392_s9 = int_to_ptr.vmem [resolvable:$true] %s3050_s9  ;;  %s4196_s22 = int_to_ptr.vmem [resolvable:$false] %s4195_s22 }
  0x26   : > { %3733 = vmatpush3.msra.mxu0 %v4371_v19  ;;  %v5460_v31 = vand.u32 4294901760, %v4377_v22  ;;  %v5459_v32 = vand.u32 4294901760, %v4380_v23  ;;  %v5458_v33 = vand.u32 4294901760, %v4383_v24  ;;  %v5457_v34 = vand.u32 4294901760, %v4386_v25  ;;  %s4191_s20 = scalar_lea.vmem %s5392_s9, 384  ;;  %s4197_s23 = scalar_lea.vmem %s4196_s22, 768 }
  0x27   : > { %5501 = vst [vmem:[#allocation8_spill] sm:$0xff] %v4389_v26  ;;  %5502 = vst [vmem:[#allocation9_spill] sm:$0xff] %v4395_v29  ;;  %3734 = vmatprep.subr.mxu0 %v4373_v21  ;;  %v4406_v35 = vand.u32 4294901760, %v794_v27  ;;  %v4409_v36 = vand.u32 4294901760, %v4393_v28  ;;  %v4412_v37 = vsub.f32 %v294_v17, %v4395_v29  ;;  %v4453_v58 = vand.u32 4294901760, %v297_v41  ;;  %p4192_p13 = scmp.ne.s32.totalorder %s5392_s9, %s4191_s20  ;;  %p4198_p2 = scmp.lt.s32.totalorder %s5392_s9, %s4196_s22 }
  0x28   : > { %3735 = vmatpush3.msra.mxu0 %v4373_v21  ;;  %v447_v38 = vsub.f32 %v4377_v22, %v5460_v31  ;;  %v457_v39 = vsub.f32 %v4380_v23, %v5459_v32  ;;  %v467_v40 = vsub.f32 %v4383_v24, %v5458_v33  ;;  %v477_v44 = vsub.f32 %v4386_v25, %v5457_v34  ;;  %v262_v34 = vld [vmem:[%s5441_s1 + $0xc0] sm:$0xff]  ;;  %p4199_p3 = scmp.lt.s32.totalorder %s4197_s23, %s4191_s20 }
  0x29   : > { %v796_v42 = vsub.f32 %v794_v27, %v4406_v35  ;;  %v803_v43 = vsub.f32 %v4393_v28, %v4409_v36  ;;  %v5456_v45 = vand.u32 4294901760, %v4412_v37  ;;  %3836 = vmatprep.subr.mxu0 %v794_v27  ;;  %5503 = vst [vmem:[#allocation10_spill] sm:$0xff] %v4453_v58  ;;  %v300_v59 = vsel %vm280_vm0, %v244_v46, 0  ;;  %p4193_p0 = pnand %p4192_p13, %p4321_p6 }
  0x2a   : > { %v448_v49 = vand.u32 4294901760, %v447_v38  ;;  %v458_v50 = vand.u32 4294901760, %v457_v39  ;;  %v468_v51 = vand.u32 4294901760, %v467_v40  ;;  %v303_v60 = vsel %vm280_vm0, %v245_v47, 0  ;;  %v250_v40 = vld [vmem:[%s5441_s1 + $0x60] sm:$0xff]  ;;  %p4200_p4 = por %p4199_p3, %p4198_p2 }
  0x2b   : > { %v797_v52 = vand.u32 4294901760, %v796_v42  ;;  %v804_v53 = vand.u32 4294901760, %v803_v43  ;;  %v487_v54 = vsub.f32 %v4412_v37, %v5456_v45  ;;  %v306_v61 = vsel %vm280_vm0, %v246_v48, 0  ;;  %p4194_p1 = pneg %p4193_p0 }
  0x2c   : > { %3736 = vmatprep.mubr.f32.mxu0 %v448_v49  ;;  %v478_v62 = vand.u32 4294901760, %v477_v44  ;;  %v4458_v0 = vand.u32 4294901760, %v300_v59  ;;  %v4460_v1 = vand.u32 4294901760, %v303_v60  ;;  %v4463_v2 = vsub.f32 %v297_v41, %v4453_v58  ;;  %v251_v49 = vld [vmem:[%s5441_s1 + $0x68] sm:$0xff] }
  0x2d   : > { %3737 = vmatmul.mubr.f32.vlgmr.msra.gmra.mxu0 %v458_v50  ;;  %3784 = vmatprep.subr.mxu1 %v797_v52  ;;  %v488_v63 = vand.u32 4294901760, %v487_v54  ;;  %v4465_v3 = vand.u32 4294901760, %v306_v61  ;;  %v309_v4 = vsel %vm280_vm0, %v247_v55, 0  ;;  %v312_v5 = vsel %vm280_vm0, %v248_v56, 0  ;;  %v252_v50 = vld [vmem:[%s5441_s1 + $0x70] sm:$0xff]  ;;  %p4201_p5 = pnand %p4200_p4, %p4194_p1 }
  0x2e   : > { %5504 = vst [vmem:[#allocation11_spill] sm:$0xff] %v4458_v0  ;;  %5505 = vst [vmem:[#allocation12_spill] sm:$0xff] %v4460_v1  ;;  %3785 = vmatpush3.msra.mxu1 %v797_v52  ;;  %3739 = vmatprep.mubr.f32.mxu0 %v468_v51  ;;  %v4470_v6 = vsub.f32 %v300_v59, %v4458_v0  ;;  %v4473_v7 = vsub.f32 %v303_v60, %v4460_v1  ;;  %v4475_v8 = vand.u32 4294901760, %v309_v4  ;;  %v254_v59 = vld [vmem:[%s5441_s1 + $0x80] sm:$0xff]  ;;  %v255_v60 = vld [vmem:[%s5441_s1 + $0x88] sm:$0xff] }
  0x2f   : > { %5506 = vst [vmem:[#allocation13_spill] sm:$0xff] %v4465_v3  ;;  %3786 = vmatprep.subr.mxu1 %v804_v53  ;;  %3837 = vmatpush3.msra.mxu0 %v794_v27  ;;  %v5452_v9 = vand.u32 4294901760, %v4463_v2  ;;  %v4479_v13 = vsub.f32 %v306_v61, %v4465_v3  ;;  %v4481_v14 = vand.u32 4294901760, %v312_v5  ;;  %v315_v15 = vsel %vm280_vm0, %v249_v57, 0 }
  0x30   : > { %5507 = vst [vmem:[#allocation14_spill] sm:$0xff] %v4475_v8  ;;  %3787 = vmatpush3.msra.mxu1 %v804_v53  ;;  %3838 = vmatprep.subr.mxu0 %v4393_v28  ;;  %v5451_v17 = vand.u32 4294901760, %v4470_v6  ;;  %v5450_v18 = vand.u32 4294901760, %v4473_v7  ;;  %v4489_v20 = vsub.f32 %v309_v4, %v4475_v8  ;;  %v4499_v39 = vand.u32 4294901760, %v315_v15 }
  0x31   : > { %5508 = vst [vmem:[#allocation15_spill] sm:$0xff] %v4481_v14  ;;  %3740 = vmatmul.mubr.f32.gmra.mxu0 %v478_v62  ;;  %3789 = vmatmul.mubr.f32.vlgmr.msra.gmra.mxu1 %v4363_v11  ;;  %v497_v27 = vsub.f32 %v4463_v2, %v5452_v9  ;;  %v5449_v30 = vand.u32 4294901760, %v4479_v13  ;;  %v4497_v38 = vsub.f32 %v312_v5, %v4481_v14  ;;  %v318_v53 = vsel %vm280_vm0, %v250_v40, 0 }
  0x32   : > { %3742 = vmatprep.mubr.f32.mxu0 %v488_v63  ;;  %3791 = vmatprep.mubr.f32.mxu1 %v4365_v12  ;;  %5509 = vst [vmem:[#allocation16_spill] sm:$0xff] %v4499_v39  ;;  %v507_v41 = vsub.f32 %v4470_v6, %v5451_v17  ;;  %v517_v42 = vsub.f32 %v4473_v7, %v5450_v18  ;;  %v5447_v43 = vand.u32 4294901760, %v4489_v20  ;;  %v4542_v57 = vand.u32 4294901760, %v318_v53 }
  0x33   : > { %3888 = vmatprep.subr.mxu1 %v4371_v19  ;;  %3839 = vmatpush3.msra.mxu0 %v4393_v28  ;;  %v498_v44 = vand.u32 4294901760, %v497_v27  ;;  %v527_v46 = vsub.f32 %v4479_v13, %v5449_v30  ;;  %v5446_v47 = vand.u32 4294901760, %v4497_v38  ;;  %v4518_v48 = vsub.f32 %v315_v15, %v4499_v39  ;;  %v253_v28 = vld [vmem:[%s5441_s1 + $0x78] sm:$0xff] }
  0x34   : > { %3889 = vmatpush3.msra.mxu1 %v4371_v19  ;;  %3940 = vmatprep.subr.mxu0 %v4406_v35  ;;  %v508_v51 = vand.u32 4294901760, %v507_v41  ;;  %v537_v52 = vsub.f32 %v4489_v20, %v5447_v43  ;;  %v518_v54 = vand.u32 4294901760, %v517_v42  ;;  %5510 = vst [vmem:[#allocation17_spill] sm:$0xff] %v4542_v57  ;;  %v321_v62 = vsel %vm280_vm0, %v251_v49, 0  ;;  %v256_v41 = vld [vmem:[%s5441_s1 + $0x90] sm:$0xff] }
  0x35   : > { %3792 = vmatmul.mubr.f32.gmra.mxu1 %v4368_v16  ;;  %3890 = vmatprep.subr.mxu1 %v4373_v21  ;;  %v547_v55 = vsub.f32 %v4497_v38, %v5446_v47  ;;  %v5445_v56 = vand.u32 4294901760, %v4518_v48  ;;  %v528_v61 = vand.u32 4294901760, %v527_v46  ;;  %v324_v63 = vsel %vm280_vm0, %v252_v50, 0 }
  0x36   : > { %3743 = vmatmul.mubr.f32.gmra.mxu0 %v498_v44  ;;  %3794 = vmatprep.mubr.f32.mxu1 %v4395_v29  ;;  %v327_v4 = vsel %vm280_vm0, %v253_v28, 0  ;;  %v538_v5 = vand.u32 4294901760, %v537_v52  ;;  %v4555_v27 = vsub.f32 %v318_v53, %v4542_v57  ;;  %v4557_v40 = vand.u32 4294901760, %v321_v62  ;;  %v257_v53 = vld [vmem:[%s5441_s1 + $0x98] sm:$0xff] }
  0x37   : > { %3745 = vmatprep.mubr.f32.mxu0 %v508_v51  ;;  %3891 = vmatpush3.msra.mxu1 %v4373_v21  ;;  %v548_v15 = vand.u32 4294901760, %v547_v55  ;;  %v4564_v42 = vand.u32 4294901760, %v324_v63  ;;  %v4566_v44 = vand.u32 4294901760, %v327_v4  ;;  %v330_v46 = vsel %vm280_vm0, %v254_v59, 0 }
  0x38   : > { %5511 = vst [vmem:[#allocation18_spill] sm:$0xff] %v4557_v40  ;;  %3992 = vmatprep.subr.mxu1 %v4371_v19  ;;  %v333_v49 = vsel %vm280_vm0, %v255_v60, 0  ;;  %v557_v50 = vsub.f32 %v4518_v48, %v5445_v56  ;;  %v5448_v28 = vand.u32 4294901760, %v4555_v27  ;;  %v4576_v51 = vsub.f32 %v321_v62, %v4557_v40 }
  0x39   : > { %3795 = vmatmul.mubr.f32.gmra.mxu1 %v4453_v58  ;;  %5512 = vst [vmem:[#allocation19_spill] sm:$0xff] %v4564_v42  ;;  %5513 = vst [vmem:[#allocation20_spill] sm:$0xff] %v4566_v44  ;;  %v4578_v52 = vand.u32 4294901760, %v330_v46  ;;  %v4587_v55 = vsub.f32 %v327_v4, %v4566_v44  ;;  %v4589_v59 = vand.u32 4294901760, %v333_v49  ;;  %v336_v60 = vsel %vm280_vm0, %v256_v41, 0 }
  0x3a   : > { %3746 = vmatmul.mubr.f32.gmra.mxu0 %v518_v54  ;;  %3797 = vmatprep.mubr.f32.mxu1 %v4458_v0  ;;  %v4584_v54 = vsub.f32 %v324_v63, %v4564_v42  ;;  %v567_v62 = vsub.f32 %v4555_v27, %v5448_v28  ;;  %v5454_v56 = vand.u32 4294901760, %v4576_v51  ;;  %v339_v41 = vsel %vm280_vm0, %v257_v53, 0  ;;  %v258_v28 = vld [vmem:[%s5441_s1 + $0xa0] sm:$0xff] }
  0x3b   : > { %5514 = vst [vmem:[#allocation21_spill] sm:$0xff] %v4578_v52  ;;  %3748 = vmatprep.mubr.f32.mxu0 %v528_v61  ;;  %v4597_v47 = vsub.f32 %v330_v46, %v4578_v52  ;;  %v4599_v61 = vand.u32 4294901760, %v336_v60  ;;  %v5455_v4 = vand.u32 4294901760, %v4587_v55  ;;  %v4605_v43 = vsub.f32 %v333_v49, %v4589_v59 }
  0x3c   : > { %v5453_v63 = vand.u32 4294901760, %v4584_v54  ;;  %v558_v46 = vand.u32 4294901760, %v557_v50  ;;  %v577_v30 = vsub.f32 %v4576_v51, %v5454_v56  ;;  %v568_v17 = vand.u32 4294901760, %v567_v62  ;;  %v260_v62 = vld [vmem:[%s5441_s1 + $0xb0] sm:$0xff]  ;;  %v261_v56 = vld [vmem:[%s5441_s1 + $0xb8] sm:$0xff] }
  0x3d   : > { %5515 = vst [vmem:[#allocation22_spill] sm:$0xff] %v4599_v61  ;;  %3798 = vmatmul.mubr.f32.gmra.mxu1 %v4460_v1  ;;  %v5461_v18 = vand.u32 4294901760, %v4597_v47  ;;  %v4620_v53 = vsub.f32 %v336_v60, %v4599_v61  ;;  %v4622_v9 = vand.u32 4294901760, %v339_v41  ;;  %v597_v50 = vsub.f32 %v4587_v55, %v5455_v4 }
  0x3e   : > { %3749 = vmatmul.mubr.f32.gmra.mxu0 %v538_v5  ;;  %3800 = vmatprep.mubr.f32.mxu1 %v4465_v3  ;;  %v587_v49 = vsub.f32 %v4584_v54, %v5453_v63  ;;  %v259_v5 = vld [vmem:[%s5441_s1 + $0xa8] sm:$0xff]  ;;  %v578_v60 = vand.u32 4294901760, %v577_v30  ;;  %v348_v31 = vsel %vm280_vm0, %v260_v62, 0  ;;  %v351_v26 = vsel %vm280_vm0, %v261_v56, 0  ;;  %v265_v56 = vld [vmem:[%s5441_s1 + $0xd8] sm:$0xff] }
  0x3f   : > { %3751 = vmatprep.mubr.f32.mxu0 %v548_v15  ;;  %v342_v15 = vsel %vm280_vm0, %v258_v28, 0  ;;  %v607_v28 = vsub.f32 %v4597_v47, %v5461_v18  ;;  %v4644_v4 = vsub.f32 %v339_v41, %v4622_v9  ;;  %v345_v30 = vsel %vm280_vm0, %v259_v5, 0  ;;  %v263_v41 = vld [vmem:[%s5441_s1 + $0xc8] sm:$0xff] }
  0x40   : > { %v4646_v45 = vand.u32 4294901760, %v342_v15  ;;  %v588_v33 = vand.u32 4294901760, %v587_v49  ;;  %v4653_v32 = vand.u32 4294901760, %v345_v30  ;;  %v598_v18 = vand.u32 4294901760, %v597_v50 }
  0x41   : > { %3801 = vmatmul.mubr.f32.gmra.mxu1 %v4475_v8  ;;  %v4662_v5 = vand.u32 4294901760, %v348_v31  ;;  %v354_v50 = vsel %vm280_vm0, %v262_v34, 0  ;;  %v5518_v34 = vand.u32 4294901760, %v4620_v53 }
  0x42   : > { %3752 = vmatmul.mubr.f32.gmra.mxu0 %v558_v46  ;;  %3803 = vmatprep.mubr.f32.mxu1 %v4481_v14  ;;  %5516 = vst [vmem:[#allocation23_spill] sm:$0xff] %v4646_v45  ;;  %v4660_v63 = vsub.f32 %v342_v15, %v4646_v45  ;;  %v4670_v62 = vsub.f32 %v345_v30, %v4653_v32  ;;  %v4672_v46 = vand.u32 4294901760, %v351_v26  ;;  %v264_v15 = vld [vmem:[%s5441_s1 + $0xd0] sm:$0xff]  ;;  %v357_v30 = vsel %vm280_vm0, %v263_v41, 0 }
  0x43   : > { %3754 = vmatprep.mubr.f32.mxu0 %v568_v17  ;;  %v5517_v17 = vand.u32 4294901760, %v4605_v43  ;;  %v608_v14 = vand.u32 4294901760, %v607_v28  ;;  %v627_v8 = vsub.f32 %v4620_v53, %v5518_v34  ;;  %v266_v28 = vld [vmem:[%s5441_s1 + $0xe0] sm:$0xff] }
  0x44   : > { %v4697_v41 = vsub.f32 %v351_v26, %v4672_v46 }
  0x45   : > { %3804 = vmatmul.mubr.f32.gmra.mxu1 %v4499_v39  ;;  %v617_v49 = vsub.f32 %v4605_v43, %v5517_v17  ;;  %v4681_v39 = vsub.f32 %v348_v31, %v4662_v5  ;;  %v4683_v17 = vand.u32 4294901760, %v354_v50  ;;  %v628_v26 = vand.u32 4294901760, %v627_v8 }
  0x46   : > { %3755 = vmatmul.mubr.f32.gmra.mxu0 %v578_v60  ;;  %3806 = vmatprep.mubr.f32.mxu1 %v4542_v57  ;;  %v360_v60 = vsel %vm280_vm0, %v264_v15, 0  ;;  %v5519_v15 = vand.u32 4294901760, %v4644_v4  ;;  %v5520_v57 = vand.u32 4294901760, %v4660_v63 }
  0x47   : > { %3757 = vmatprep.mubr.f32.mxu0 %v588_v33  ;;  %v4699_v33 = vand.u32 4294901760, %v357_v30  ;;  %v618_v34 = vand.u32 4294901760, %v617_v49  ;;  %v4710_v31 = vsub.f32 %v354_v50, %v4683_v17  ;;  %v4715_v0 = vand.u32 4294901760, %v360_v60 }
  0x48   : > { %v637_v3 = vsub.f32 %v4644_v4, %v5519_v15  ;;  %v647_v1 = vsub.f32 %v4660_v63, %v5520_v57  ;;  %v366_v49 = vsel %vm280_vm0, %v266_v28, 0  ;;  %v267_v15 = vld [vmem:[%s5441_s1 + $0xe8] sm:$0xff]  ;;  %v5521_v50 = vand.u32 4294901760, %v4670_v62 }
  0x49   : > { %3807 = vmatmul.mubr.f32.gmra.mxu1 %v4557_v40  ;;  %v5487_v40 = vand.u32 4294901760, %v4681_v39  ;;  %v4728_v57 = vsub.f32 %v357_v30, %v4699_v33  ;;  %v4741_v30 = vsub.f32 %v360_v60, %v4715_v0  ;;  %v4743_v58 = vand.u32 4294901760, %v366_v49 }
  0x4a   : > { %3758 = vmatmul.mubr.f32.gmra.mxu0 %v598_v18  ;;  %3809 = vmatprep.mubr.f32.mxu1 %v4564_v42  ;;  %v363_v18 = vsel %vm280_vm0, %v265_v56, 0  ;;  %v657_v8 = vsub.f32 %v4670_v62, %v5521_v50  ;;  %v268_v56 = vld [vmem:[%s5441_s1 + $0xf0] sm:$0xff]  ;;  %v638_v28 = vand.u32 4294901760, %v637_v3  ;;  %v5522_v42 = vand.u32 4294901760, %v4697_v41 }
  0x4b   : > { %3760 = vmatprep.mubr.f32.mxu0 %v608_v14  ;;  %v4738_v50 = vand.u32 4294901760, %v363_v18  ;;  %v648_v14 = vand.u32 4294901760, %v647_v1  ;;  %v372_v3 = vsel %vm280_vm0, %v268_v56, 0 }
  0x4c   : > { %v677_v1 = vsub.f32 %v4697_v41, %v5522_v42  ;;  %v4766_v42 = vsub.f32 %v366_v49, %v4743_v58  ;;  %v4768_v60 = vand.u32 4294901760, %v372_v3 }
  0x4d   : > { %3810 = vmatmul.mubr.f32.gmra.mxu1 %v4566_v44  ;;  %v667_v44 = vsub.f32 %v4681_v39, %v5487_v40  ;;  %v658_v40 = vand.u32 4294901760, %v657_v8  ;;  %v4760_v29 = vsub.f32 %v363_v18, %v4738_v50  ;;  %v5524_v18 = vand.u32 4294901760, %v4728_v57 }
  0x4e   : > { %3761 = vmatmul.mubr.f32.gmra.mxu0 %v618_v34  ;;  %3812 = vmatprep.mubr.f32.mxu1 %v4578_v52  ;;  %v369_v34 = vsel %vm280_vm0, %v267_v15, 0  ;;  %v269_v52 = vld [vmem:[%s5441_s1 + $0xf8] sm:$0xff]  ;;  %v5523_v15 = vand.u32 4294901760, %v4710_v31 }
  0x4f   : > { %3763 = vmatprep.mubr.f32.mxu0 %v628_v26  ;;  %v668_v26 = vand.u32 4294901760, %v667_v44  ;;  %v4762_v16 = vand.u32 4294901760, %v369_v34  ;;  %v678_v44 = vand.u32 4294901760, %v677_v1 }
  0x50   : > { %v687_v56 = vsub.f32 %v4710_v31, %v5523_v15  ;;  %v697_v15 = vsub.f32 %v4728_v57, %v5524_v18 }
  0x51   : > { %3813 = vmatmul.mubr.f32.gmra.mxu1 %v4589_v59  ;;  %v4778_v8 = vsub.f32 %v369_v34, %v4762_v16 }
  0x52   : > { %3764 = vmatmul.mubr.f32.gmra.mxu0 %v638_v28  ;;  %3815 = vmatprep.mubr.f32.mxu1 %v4599_v61  ;;  %v375_v28 = vsel %vm280_vm0, %v269_v52, 0  ;;  %v688_v61 = vand.u32 4294901760, %v687_v56  ;;  %v5525_v52 = vand.u32 4294901760, %v4741_v30  ;;  %v698_v18 = vand.u32 4294901760, %v697_v15 }
  0x53   : > { %3766 = vmatprep.mubr.f32.mxu0 %v648_v14  ;;  %v5496_v14 = vand.u32 4294901760, %v4760_v29  ;;  %v4780_v49 = vand.u32 4294901760, %v375_v28 }
  0x54   : > { %v707_v1 = vsub.f32 %v4741_v30, %v5525_v52 }
  0x55   : > { %3816 = vmatmul.mubr.f32.gmra.mxu1 %v4622_v9  ;;  %v717_v34 = vsub.f32 %v4760_v29, %v5496_v14  ;;  %v4796_v56 = vsub.f32 %v375_v28, %v4780_v49 }
  0x56   : > { %3767 = vmatmul.mubr.f32.gmra.mxu0 %v658_v40  ;;  %3818 = vmatprep.mubr.f32.mxu1 %v4646_v45  ;;  %v5497_v40 = vand.u32 4294901760, %v4766_v42  ;;  %v4787_v45 = vsub.f32 %v372_v3, %v4768_v60  ;;  %v708_v52 = vand.u32 4294901760, %v707_v1 }
  0x57   : > { %3769 = vmatprep.mubr.f32.mxu0 %v668_v26  ;;  %v736_v26 = vand.u32 4294901760, %v4778_v8  ;;  %v718_v15 = vand.u32 4294901760, %v717_v34  ;;  %v756_v28 = vand.u32 4294901760, %v4796_v56 }
  0x58   : > { %v727_v3 = vsub.f32 %v4766_v42, %v5497_v40 }
  0x59   : > { %3819 = vmatmul.mubr.f32.gmra.mxu1 %v4653_v32  ;;  %v737_v14 = vsub.f32 %v4778_v8, %v736_v26 }
  0x5a   : > { %3770 = vmatmul.mubr.f32.gmra.mxu0 %v678_v44  ;;  %3821 = vmatprep.mubr.f32.mxu1 %v4662_v5  ;;  %v746_v44 = vand.u32 4294901760, %v4787_v45 }
  0x5b   : > { %3772 = vmatprep.mubr.f32.mxu0 %v688_v61  ;;  %v728_v61 = vand.u32 4294901760, %v727_v3  ;;  %v738_v40 = vand.u32 4294901760, %v737_v14  ;;  %v5526_v14 = vand.u32 4294901760, %v4377_v22  ;;  %v5528_v3 = vand.u32 4294901760, %v4383_v24 }
  0x5c   : > { %v747_v1 = vsub.f32 %v4787_v45, %v746_v44 }
  0x5d   : > { %3822 = vmatmul.mubr.f32.gmra.mxu1 %v4672_v46 }
  0x5e   : > { %3773 = vmatmul.mubr.f32.gmra.mxu0 %v698_v18  ;;  %3824 = vmatprep.mubr.f32.mxu1 %v4683_v17  ;;  %v757_v18 = vsub.f32 %v4796_v56, %v756_v28  ;;  %v748_v34 = vand.u32 4294901760, %v747_v1 }
  0x5f   : > { %3775 = vmatprep.mubr.f32.mxu0 %v708_v52 }
  0x60   : > { %v758_v52 = vand.u32 4294901760, %v757_v18 }
  0x61   : > { %3825 = vmatmul.mubr.f32.gmra.mxu1 %v4699_v33 }
  0x62   : > { %3776 = vmatmul.mubr.f32.gmra.mxu0 %v718_v15  ;;  %3827 = vmatprep.mubr.f32.mxu1 %v4715_v0  ;;  %v5570_v15 = vld [vmem:[#allocation8_spill] sm:$0xff] }
  0x63   : > { %3778 = vmatprep.mubr.f32.mxu0 %v728_v61  ;;  %v5571_v61 = vld [vmem:[#allocation23_spill] sm:$0xff] }
  0x65   : > { %3828 = vmatmul.mubr.f32.gmra.mxu1 %v4738_v50 }
  0x66   : > { %3779 = vmatmul.mubr.f32.gmra.mxu0 %v738_v40  ;;  %3830 = vmatprep.mubr.f32.mxu1 %v4743_v58  ;;  %v5527_v40 = vand.u32 4294901760, %v4380_v23 }
  0x67   : > { %3781 = vmatprep.mubr.f32.mxu0 %v748_v34 }
  0x69   : > { %3831 = vmatmul.mubr.f32.gmra.mxu1 %v4762_v16 }
  0x6a   : > { %3782 = vmatmul.mubr.f32.gmra.mxu0 %v758_v52  ;;  %3833 = vmatprep.mubr.f32.mxu1 %v4768_v60 }
  0x6b   : > { %3840 = vmatprep.mubr.f32.mxu0 %v4377_v22  ;;  %v5529_v22 = vand.u32 4294901760, %v4386_v25 }
  0x6d   : > { %3834 = vmatmul.mubr.f32.gmra.mxu1 %v4780_v49 }
  0x6e   : > { %3841 = vmatmul.mubr.f32.vlgmr.msra.gmra.mxu0 %v4380_v23  ;;  %3892 = vmatprep.mubr.f32.mxu1 %v5526_v14  ;;  %v5530_v23 = vand.u32 4294901760, %v4412_v37 }
  0x6f   : > { %3843 = vmatprep.mubr.f32.mxu0 %v4383_v24  ;;  %3941 = vmatpush3.msra.mxu0 %v4406_v35  ;;  %v5531_v24 = vand.u32 4294901760, %v4463_v2  ;;  %v5534_v35 = vand.u32 4294901760, %v4479_v13 }
  0x70   : > { %3942 = vmatprep.subr.mxu0 %v4409_v36 }
  0x71   : > { %3893 = vmatmul.mubr.f32.vlgmr.msra.gmra.mxu1 %v5527_v40  ;;  %3943 = vmatpush3.msra.mxu0 %v4409_v36  ;;  %v5536_v36 = vand.u32 4294901760, %v4497_v38 }
  0x72   : > { %3844 = vmatmul.mubr.f32.gmra.mxu0 %v4386_v25  ;;  %3895 = vmatprep.mubr.f32.mxu1 %v5528_v3  ;;  %v5533_v25 = vand.u32 4294901760, %v4473_v7 }
  0x73   : > { %3846 = vmatprep.mubr.f32.mxu0 %v4412_v37  ;;  %3993 = vmatpush3.msra.mxu1 %v4371_v19  ;;  %v5532_v19 = vand.u32 4294901760, %v4470_v6  ;;  %v5537_v37 = vand.u32 4294901760, %v4518_v48 }
  0x74   : > { %3994 = vmatprep.subr.mxu1 %v4373_v21 }
  0x75   : > { %3896 = vmatmul.mubr.f32.gmra.mxu1 %v5529_v22 }
  0x76   : > { %3847 = vmatmul.mubr.f32.gmra.mxu0 %v4463_v2  ;;  %3898 = vmatprep.mubr.f32.mxu1 %v5530_v23  ;;  %v5538_v2 = vand.u32 4294901760, %v4555_v27 }
  0x77   : > { %3849 = vmatprep.mubr.f32.mxu0 %v4470_v6  ;;  %3995 = vmatpush3.msra.mxu1 %v4373_v21  ;;  %v5535_v21 = vand.u32 4294901760, %v4489_v20  ;;  %v5539_v6 = vand.u32 4294901760, %v4576_v51 }
  0x79   : > { %3899 = vmatmul.mubr.f32.gmra.mxu1 %v5531_v24 }
  0x7a   : > { %3850 = vmatmul.mubr.f32.gmra.mxu0 %v4473_v7  ;;  %3901 = vmatprep.mubr.f32.mxu1 %v5532_v19  ;;  %v5540_v7 = vand.u32 4294901760, %v4584_v54 }
  0x7b   : > { %3852 = vmatprep.mubr.f32.mxu0 %v4479_v13  ;;  %v5541_v13 = vand.u32 4294901760, %v4587_v55 }
  0x7d   : > { %3902 = vmatmul.mubr.f32.gmra.mxu1 %v5533_v25 }
  0x7e   : > { %3853 = vmatmul.mubr.f32.gmra.mxu0 %v4489_v20  ;;  %3904 = vmatprep.mubr.f32.mxu1 %v5534_v35  ;;  %v5542_v20 = vand.u32 4294901760, %v4597_v47 }
  0x7f   : > { %3855 = vmatprep.mubr.f32.mxu0 %v4497_v38  ;;  %v5543_v38 = vand.u32 4294901760, %v4605_v43 }
  0x81   : > { %3905 = vmatmul.mubr.f32.gmra.mxu1 %v5535_v21 }
  0x82   : > { %3856 = vmatmul.mubr.f32.gmra.mxu0 %v4518_v48  ;;  %3907 = vmatprep.mubr.f32.mxu1 %v5536_v36  ;;  %v5544_v48 = vand.u32 4294901760, %v4620_v53 }
  0x83   : > { %3858 = vmatprep.mubr.f32.mxu0 %v4555_v27  ;;  %v5545_v27 = vand.u32 4294901760, %v4644_v4 }
  0x85   : > { %3908 = vmatmul.mubr.f32.gmra.mxu1 %v5537_v37 }
  0x86   : > { %3859 = vmatmul.mubr.f32.gmra.mxu0 %v4576_v51  ;;  %3910 = vmatprep.mubr.f32.mxu1 %v5538_v2  ;;  %v5548_v51 = vand.u32 4294901760, %v4681_v39 }
  0x87   : > { %3861 = vmatprep.mubr.f32.mxu0 %v4584_v54  ;;  %v5549_v54 = vand.u32 4294901760, %v4697_v41 }
  0x89   : > { %3911 = vmatmul.mubr.f32.gmra.mxu1 %v5539_v6 }
  0x8a   : > { %3862 = vmatmul.mubr.f32.gmra.mxu0 %v4587_v55  ;;  %3913 = vmatprep.mubr.f32.mxu1 %v5540_v7  ;;  %v5550_v55 = vand.u32 4294901760, %v4710_v31 }
  0x8b   : > { %3864 = vmatprep.mubr.f32.mxu0 %v4597_v47  ;;  %v5546_v47 = vand.u32 4294901760, %v4660_v63 }
  0x8d   : > { %3914 = vmatmul.mubr.f32.gmra.mxu1 %v5541_v13 }
  0x8e   : > { %3865 = vmatmul.mubr.f32.gmra.mxu0 %v4605_v43  ;;  %3916 = vmatprep.mubr.f32.mxu1 %v5542_v20  ;;  %v5547_v43 = vand.u32 4294901760, %v4670_v62 }
  0x8f   : > { %3867 = vmatprep.mubr.f32.mxu0 %v4620_v53  ;;  %v5554_v53 = vand.u32 4294901760, %v4766_v42 }
  0x91   : > { %3917 = vmatmul.mubr.f32.gmra.mxu1 %v5543_v38 }
  0x92   : > { %3868 = vmatmul.mubr.f32.gmra.mxu0 %v4644_v4  ;;  %3919 = vmatprep.mubr.f32.mxu1 %v5544_v48  ;;  %v5553_v4 = vand.u32 4294901760, %v4760_v29 }
  0x93   : > { %3870 = vmatprep.mubr.f32.mxu0 %v4660_v63  ;;  %v5551_v63 = vand.u32 4294901760, %v4728_v57 }
  0x95   : > { %3920 = vmatmul.mubr.f32.gmra.mxu1 %v5545_v27 }
  0x96   : > { %3871 = vmatmul.mubr.f32.gmra.mxu0 %v4670_v62  ;;  %3922 = vmatprep.mubr.f32.mxu1 %v5546_v47  ;;  %v5556_v62 = vld [vmem:[#allocation9_spill] sm:$0xff] }
  0x97   : > { %3873 = vmatprep.mubr.f32.mxu0 %v4681_v39  ;;  %v5552_v39 = vand.u32 4294901760, %v4741_v30 }
  0x99   : > { %3923 = vmatmul.mubr.f32.gmra.mxu1 %v5547_v43 }
  0x9a   : > { %3874 = vmatmul.mubr.f32.gmra.mxu0 %v4697_v41  ;;  %3925 = vmatprep.mubr.f32.mxu1 %v5548_v51  ;;  %v5562_v41 = vld [vmem:[#allocation15_spill] sm:$0xff] }
  0x9b   : > { %3876 = vmatprep.mubr.f32.mxu0 %v4710_v31  ;;  %v5558_v31 = vld [vmem:[#allocation11_spill] sm:$0xff] }
  0x9d   : > { %3926 = vmatmul.mubr.f32.gmra.mxu1 %v5549_v54 }
  0x9e   : > { %3877 = vmatmul.mubr.f32.gmra.mxu0 %v4728_v57  ;;  %3928 = vmatprep.mubr.f32.mxu1 %v5550_v55  ;;  %v5563_v57 = vld [vmem:[#allocation16_spill] sm:$0xff] }
  0x9f   : > { %3879 = vmatprep.mubr.f32.mxu0 %v4741_v30  ;;  %v5564_v30 = vld [vmem:[#allocation17_spill] sm:$0xff] }
  0xa1   : > { %3929 = vmatmul.mubr.f32.gmra.mxu1 %v5551_v63 }
  0xa2   : > { %3880 = vmatmul.mubr.f32.gmra.mxu0 %v4760_v29  ;;  %3931 = vmatprep.mubr.f32.mxu1 %v5552_v39  ;;  %v5555_v29 = vld [vmem:[#allocation7_spill] sm:$0xff] }
  0xa3   : > { %3882 = vmatprep.mubr.f32.mxu0 %v4766_v42  ;;  %v5566_v42 = vld [vmem:[#allocation19_spill] sm:$0xff] }
  0xa5   : > { %3932 = vmatmul.mubr.f32.gmra.mxu1 %v5553_v4 }
  0xa6   : > { %3883 = vmatmul.mubr.f32.gmra.mxu0 %v4778_v8  ;;  %3934 = vmatprep.mubr.f32.mxu1 %v5554_v53  ;;  %v5565_v8 = vld [vmem:[#allocation18_spill] sm:$0xff] }
  0xa7   : > { %3885 = vmatprep.mubr.f32.mxu0 %v4787_v45  ;;  %v5557_v45 = vld [vmem:[#allocation10_spill] sm:$0xff] }
  0xa9   : > { %3935 = vmatmul.mubr.f32.gmra.mxu1 %v736_v26  ;;  %v5567_v26 = vld [vmem:[#allocation20_spill] sm:$0xff] }
  0xaa   : > { %3886 = vmatmul.mubr.f32.gmra.mxu0 %v4796_v56  ;;  %3937 = vmatprep.mubr.f32.mxu1 %v746_v44  ;;  %v5568_v56 = vld [vmem:[#allocation21_spill] sm:$0xff]  ;;  %v5569_v44 = vld [vmem:[#allocation22_spill] sm:$0xff] }
  0xab   : > { %3944 = vmatprep.mubr.f32.mxu0 %v4361_v10 }
  0xad   : > { %3938 = vmatmul.mubr.f32.gmra.mxu1 %v756_v28  ;;  %v273_v28 = vrot.slane %v5570_v15, 4 }
  0xae   : > { %3945 = vmatmul.mubr.f32.vlgmr.msra.gmra.mxu0 %v4363_v11  ;;  %3996 = vmatprep.mubr.f32.mxu1 %v4361_v10  ;;  %v5559_v10 = vld [vmem:[#allocation12_spill] sm:$0xff] }
  0xaf   : > { %3947 = vmatprep.mubr.f32.mxu0 %v4365_v12  ;;  %v274_v1 = vadd.f32 %v273_v28, %v5570_v15 }
  0xb1   : > { %3997 = vmatmul.mubr.f32.vlgmr.msra.gmra.mxu1 %v4363_v11  ;;  %v5560_v11 = vld [vmem:[#allocation13_spill] sm:$0xff] }
  0xb2   : > { %3948 = vmatmul.mubr.f32.gmra.mxu0 %v5555_v29  ;;  %3999 = vmatprep.mubr.f32.mxu1 %v4365_v12  ;;  %v5561_v12 = vld [vmem:[#allocation14_spill] sm:$0xff] }
  0xb3   : > { %3950 = vmatprep.mubr.f32.mxu0 %v5556_v62 }
  0xb5   : > { %4000 = vmatmul.mubr.f32.gmra.mxu1 %v5555_v29 }
  0xb6   : > { %3951 = vmatmul.mubr.f32.gmra.mxu0 %v5557_v45  ;;  %4002 = vmatprep.mubr.f32.mxu1 %v5556_v62 }
  0xb7   : > { %3953 = vmatprep.mubr.f32.mxu0 %v5558_v31 }
  0xb9   : > { %4003 = vmatmul.mubr.f32.gmra.mxu1 %v5557_v45 }
  0xba   : > { %3954 = vmatmul.mubr.f32.gmra.mxu0 %v5559_v10  ;;  %4005 = vmatprep.mubr.f32.mxu1 %v5558_v31 }
  0xbb   : > { %3956 = vmatprep.mubr.f32.mxu0 %v5560_v11 }
  0xbd   : > { %4006 = vmatmul.mubr.f32.gmra.mxu1 %v5559_v10 }
  0xbe   : > { %3957 = vmatmul.mubr.f32.gmra.mxu0 %v5561_v12  ;;  %4008 = vmatprep.mubr.f32.mxu1 %v5560_v11 }
  0xbf   : > { %3959 = vmatprep.mubr.f32.mxu0 %v5562_v41 }
  0xc1   : > { %4009 = vmatmul.mubr.f32.gmra.mxu1 %v5561_v12 }
  0xc2   : > { %3960 = vmatmul.mubr.f32.gmra.mxu0 %v5563_v57  ;;  %4011 = vmatprep.mubr.f32.mxu1 %v5562_v41 }
  0xc3   : > { %3962 = vmatprep.mubr.f32.mxu0 %v5564_v30 }
  0xc5   : > { %4012 = vmatmul.mubr.f32.gmra.mxu1 %v5563_v57 }
  0xc6   : > { %3963 = vmatmul.mubr.f32.gmra.mxu0 %v5565_v8  ;;  %4014 = vmatprep.mubr.f32.mxu1 %v5564_v30 }
  0xc7   : > { %3965 = vmatprep.mubr.f32.mxu0 %v5566_v42 }
  0xc9   : > { %4015 = vmatmul.mubr.f32.gmra.mxu1 %v5565_v8 }
  0xca   : > { %3966 = vmatmul.mubr.f32.gmra.mxu0 %v5567_v26  ;;  %4017 = vmatprep.mubr.f32.mxu1 %v5566_v42 }
  0xcb   : > { %3968 = vmatprep.mubr.f32.mxu0 %v5568_v56 }
  0xcd   : > { %4018 = vmatmul.mubr.f32.gmra.mxu1 %v5567_v26 }
  0xce   : > { %3969 = vmatmul.mubr.f32.gmra.mxu0 %v4589_v59  ;;  %4020 = vmatprep.mubr.f32.mxu1 %v5568_v56 }
  0xcf   : > { %3971 = vmatprep.mubr.f32.mxu0 %v5569_v44 }
  0xd1   : > { %4021 = vmatmul.mubr.f32.gmra.mxu1 %v4589_v59  ;;  %v275_v59 = vrot.slane %v274_v1, 2 }
  0xd2   : > { %3972 = vmatmul.mubr.f32.gmra.mxu0 %v4622_v9  ;;  %4023 = vmatprep.mubr.f32.mxu1 %v5569_v44 }
  0xd3   : > { %3974 = vmatprep.mubr.f32.mxu0 %v5571_v61 }
  0xd5   : > { %4024 = vmatmul.mubr.f32.gmra.mxu1 %v4622_v9  ;;  %v276_v9 = vadd.f32 %v275_v59, %v274_v1 }
  0xd6   : > { %3975 = vmatmul.mubr.f32.gmra.mxu0 %v4653_v32  ;;  %4026 = vmatprep.mubr.f32.mxu1 %v5571_v61 }
  0xd7   : > { %3977 = vmatprep.mubr.f32.mxu0 %v4662_v5  ;;  %v277_v18 = vrot.slane %v276_v9, 1 }
  0xd9   : > { %4027 = vmatmul.mubr.f32.gmra.mxu1 %v4653_v32  ;;  %v278_v32 = vadd.f32 %v277_v18, %v276_v9 }
  0xda   : > { %3978 = vmatmul.mubr.f32.gmra.mxu0 %v4672_v46  ;;  %4029 = vmatprep.mubr.f32.mxu1 %v4662_v5 }
  0xdb   : > { %3980 = vmatprep.mubr.f32.mxu0 %v4683_v17 }
  0xdd   : > { %4030 = vmatmul.mubr.f32.gmra.mxu1 %v4672_v46  ;;  %v4986_v46 = vadd.f32 -1.0, %v278_v32 }
  0xde   : > { %3981 = vmatmul.mubr.f32.gmra.mxu0 %v4699_v33  ;;  %4032 = vmatprep.mubr.f32.mxu1 %v4683_v17 }
  0xdf   : > { %3983 = vmatprep.mubr.f32.mxu0 %v4715_v0 }
  0xe1   : > { %4033 = vmatmul.mubr.f32.gmra.mxu1 %v4699_v33 }
  0xe2   : > { %3984 = vmatmul.mubr.f32.gmra.mxu0 %v4738_v50  ;;  %4035 = vmatprep.mubr.f32.mxu1 %v4715_v0 }
  0xe3   : > { %3986 = vmatprep.mubr.f32.mxu0 %v4743_v58 }
  0xe5   : > { %4036 = vmatmul.mubr.f32.gmra.mxu1 %v4738_v50 }
  0xe6   : > { %3987 = vmatmul.mubr.f32.gmra.mxu0 %v4762_v16  ;;  %4038 = vmatprep.mubr.f32.mxu1 %v4743_v58 }
  0xe7   : > { %3989 = vmatprep.mubr.f32.mxu0 %v4768_v60 }
  0xe9   : > { %4039 = vmatmul.mubr.f32.gmra.mxu1 %v4762_v16 }
  0xea   : > { %3990 = vmatmul.mubr.f32.gmra.mxu0 %v4780_v49  ;;  %4041 = vmatprep.mubr.f32.mxu1 %v4768_v60 }
  0xed   : > { %v3738_v0 = vpop.f32.mrf.mxu0  ;;  %4042 = vmatmul.mubr.f32.gmra.mxu1 %v4780_v49 }
  0xee   : > { %v461_v5 = vadd.f32 %v3738_v0, %v4986_v46 }
  0xef   : > { %v450_v17 = vpop.f32.mrf.mxu0 }
  0xf0   : > { %v451_v33 = vadd.f32 %v4986_v46, %v450_v17 }
  0xf1   : > { %v3741_v50 = vpop.f32.mrf.mxu0  ;;  %v3790_v58 = vpop.f32.mrf.mxu1 }
  0xf2   : > { %v481_v34 = vadd.f32 %v3741_v50, %v4986_v46  ;;  %v4994_v52 = vadd.f32 %v3790_v58, %v461_v5 }
  0xf3   : > { %v470_v16 = vpop.f32.mrf.mxu0  ;;  %v841_v14 = vpop.f32.mrf.mxu1 }
  0xf4   : > { %v471_v40 = vadd.f32 %v4986_v46, %v470_v16  ;;  %v4997_v3 = vadd.f32 %v841_v14, %v451_v33 }
  0xf5   : > { %v3793_v60 = vpop.f32.mrf.mxu1 }
  0xf6   : > { %v3744_v22 = vpop.f32.mrf.mxu0  ;;  %v4999_v49 = vadd.f32 %v3793_v60, %v481_v34 }
  0xf7   : > { %v501_v23 = vadd.f32 %v3744_v22, %v4986_v46  ;;  %v853_v24 = vpop.f32.mrf.mxu1 }
  0xf8   : > { %v490_v19 = vpop.f32.mrf.mxu0  ;;  %v5002_v25 = vadd.f32 %v853_v24, %v471_v40 }
  0xf9   : > { %v491_v35 = vadd.f32 %v4986_v46, %v490_v19  ;;  %v3796_v21 = vpop.f32.mrf.mxu1 }
  0xfa   : > { %v3747_v36 = vpop.f32.mrf.mxu0  ;;  %v5005_v37 = vadd.f32 %v3796_v21, %v501_v23 }
  0xfb   : > { %v521_v2 = vadd.f32 %v3747_v36, %v4986_v46  ;;  %v865_v6 = vpop.f32.mrf.mxu1 }
  0xfc   : > { %v510_v7 = vpop.f32.mrf.mxu0  ;;  %v5008_v13 = vadd.f32 %v865_v6, %v491_v35 }
  0xfd   : > { %v511_v20 = vadd.f32 %v4986_v46, %v510_v7  ;;  %v3799_v38 = vpop.f32.mrf.mxu1 }
  0xfe   : > { %v3750_v48 = vpop.f32.mrf.mxu0  ;;  %v5011_v27 = vadd.f32 %v3799_v38, %v521_v2 }
  0xff   : > { %v541_v47 = vadd.f32 %v3750_v48, %v4986_v46  ;;  %v877_v43 = vpop.f32.mrf.mxu1 }
 0x100   : > { %v530_v51 = vpop.f32.mrf.mxu0  ;;  %v5014_v54 = vadd.f32 %v877_v43, %v511_v20 }
 0x101   : > { %v531_v55 = vadd.f32 %v4986_v46, %v530_v51  ;;  %v3802_v63 = vpop.f32.mrf.mxu1 }
 0x102   : > { %v3753_v39 = vpop.f32.mrf.mxu0  ;;  %v5017_v4 = vadd.f32 %v3802_v63, %v541_v47 }
 0x103   : > { %v561_v53 = vadd.f32 %v3753_v39, %v4986_v46  ;;  %v889_v29 = vpop.f32.mrf.mxu1 }
 0x104   : > { %v550_v62 = vpop.f32.mrf.mxu0  ;;  %v5020_v45 = vadd.f32 %v889_v29, %v531_v55 }
 0x105   : > { %v551_v31 = vadd.f32 %v4986_v46, %v550_v62  ;;  %v3805_v10 = vpop.f32.mrf.mxu1 }
 0x106   : > { %v3756_v11 = vpop.f32.mrf.mxu0  ;;  %v5023_v12 = vadd.f32 %v3805_v10, %v561_v53 }
 0x107   : > { %v581_v41 = vadd.f32 %v3756_v11, %v4986_v46  ;;  %v901_v57 = vpop.f32.mrf.mxu1 }
 0x108   : > { %v570_v30 = vpop.f32.mrf.mxu0  ;;  %v5026_v8 = vadd.f32 %v901_v57, %v551_v31 }
 0x109   : > { %v571_v42 = vadd.f32 %v4986_v46, %v570_v30  ;;  %v3808_v26 = vpop.f32.mrf.mxu1 }
 0x10a   : > { %v3759_v56 = vpop.f32.mrf.mxu0  ;;  %v5029_v44 = vadd.f32 %v3808_v26, %v581_v41 }
 0x10b   : > { %v601_v15 = vadd.f32 %v3759_v56, %v4986_v46  ;;  %v913_v28 = vpop.f32.mrf.mxu1 }
 0x10c   : > { %v590_v61 = vpop.f32.mrf.mxu0  ;;  %v5032_v1 = vadd.f32 %v913_v28, %v571_v42 }
 0x10d   : > { %v591_v59 = vadd.f32 %v4986_v46, %v590_v61  ;;  %v3811_v9 = vpop.f32.mrf.mxu1 }
 0x10e   : > { %v3762_v18 = vpop.f32.mrf.mxu0  ;;  %v5035_v32 = vadd.f32 %v3811_v9, %v601_v15 }
 0x10f   : > { %v621_v0 = vadd.f32 %v3762_v18, %v4986_v46  ;;  %v925_v5 = vpop.f32.mrf.mxu1 }
 0x110   : > { %v610_v17 = vpop.f32.mrf.mxu0  ;;  %v5038_v33 = vadd.f32 %v925_v5, %v591_v59 }
 0x111   : > { %v611_v50 = vadd.f32 %v4986_v46, %v610_v17  ;;  %v3814_v58 = vpop.f32.mrf.mxu1 }
 0x112   : > { %v3765_v34 = vpop.f32.mrf.mxu0  ;;  %v5041_v16 = vadd.f32 %v3814_v58, %v621_v0 }
 0x113   : > { %v641_v14 = vadd.f32 %v3765_v34, %v4986_v46  ;;  %v937_v40 = vpop.f32.mrf.mxu1 }
 0x114   : > { %v630_v60 = vpop.f32.mrf.mxu0  ;;  %v5044_v22 = vadd.f32 %v937_v40, %v611_v50 }
 0x115   : > { %v631_v23 = vadd.f32 %v4986_v46, %v630_v60  ;;  %v3817_v24 = vpop.f32.mrf.mxu1 }
 0x116   : > { %5572 = vst [vmem:[#allocation7_spill] sm:$0xff] %v5044_v22  ;;  %v3768_v19 = vpop.f32.mrf.mxu0  ;;  %v5047_v35 = vadd.f32 %v3817_v24, %v641_v14 }
 0x117   : > { %v661_v21 = vadd.f32 %v3768_v19, %v4986_v46  ;;  %v949_v36 = vpop.f32.mrf.mxu1 }
 0x118   : > { %5573 = vst [vmem:[#allocation9_spill] sm:$0xff] %v5047_v35  ;;  %v650_v2 = vpop.f32.mrf.mxu0  ;;  %v5050_v6 = vadd.f32 %v949_v36, %v631_v23 }
 0x119   : > { %v651_v7 = vadd.f32 %v4986_v46, %v650_v2  ;;  %v3820_v20 = vpop.f32.mrf.mxu1 }
 0x11a   : > { %5574 = vst [vmem:[#allocation10_spill] sm:$0xff] %v5050_v6  ;;  %v3771_v38 = vpop.f32.mrf.mxu0  ;;  %v5053_v48 = vadd.f32 %v3820_v20, %v661_v21 }
 0x11b   : > { %v681_v47 = vadd.f32 %v3771_v38, %v4986_v46  ;;  %v961_v43 = vpop.f32.mrf.mxu1 }
 0x11c   : > { %v670_v51 = vpop.f32.mrf.mxu0  ;;  %v5056_v55 = vadd.f32 %v961_v43, %v651_v7 }
 0x11d   : > { %v671_v63 = vadd.f32 %v4986_v46, %v670_v51  ;;  %v3823_v39 = vpop.f32.mrf.mxu1 }
 0x11e   : > { %5575 = vst [vmem:[#allocation11_spill] sm:$0xff] %v5056_v55  ;;  %v3774_v53 = vpop.f32.mrf.mxu0  ;;  %v5059_v29 = vadd.f32 %v3823_v39, %v681_v47 }
 0x11f   : > { %v701_v62 = vadd.f32 %v3774_v53, %v4986_v46  ;;  %v973_v31 = vpop.f32.mrf.mxu1 }
 0x120   : > { %5576 = vst [vmem:[#allocation12_spill] sm:$0xff] %v5059_v29  ;;  %v690_v10 = vpop.f32.mrf.mxu0  ;;  %v5062_v11 = vadd.f32 %v973_v31, %v671_v63 }
 0x121   : > { %v691_v41 = vadd.f32 %v4986_v46, %v690_v10  ;;  %v3826_v57 = vpop.f32.mrf.mxu1 }
 0x122   : > { %5577 = vst [vmem:[#allocation13_spill] sm:$0xff] %v5062_v11  ;;  %v3777_v30 = vpop.f32.mrf.mxu0  ;;  %v5065_v42 = vadd.f32 %v3826_v57, %v701_v62 }
 0x123   : > { %v721_v26 = vadd.f32 %v3777_v30, %v4986_v46  ;;  %v985_v56 = vpop.f32.mrf.mxu1 }
 0x124   : > { %v710_v15 = vpop.f32.mrf.mxu0  ;;  %v5068_v28 = vadd.f32 %v985_v56, %v691_v41 }
 0x125   : > { %v711_v61 = vadd.f32 %v4986_v46, %v710_v15  ;;  %v3829_v59 = vpop.f32.mrf.mxu1 }
 0x126   : > { %5578 = vst [vmem:[#allocation14_spill] sm:$0xff] %v5068_v28  ;;  %v3780_v9 = vpop.f32.mrf.mxu0  ;;  %v5071_v18 = vadd.f32 %v3829_v59, %v721_v26 }
 0x127   : > { %v741_v0 = vadd.f32 %v3780_v9, %v4986_v46  ;;  %v997_v5 = vpop.f32.mrf.mxu1 }
 0x128   : > { %5579 = vst [vmem:[#allocation15_spill] sm:$0xff] %v5071_v18  ;;  %v730_v17 = vpop.f32.mrf.mxu0  ;;  %v5074_v50 = vadd.f32 %v997_v5, %v711_v61 }
 0x129   : > { %v731_v58 = vadd.f32 %v4986_v46, %v730_v17  ;;  %v3832_v34 = vpop.f32.mrf.mxu1 }
 0x12a   : > { %5580 = vst [vmem:[#allocation16_spill] sm:$0xff] %v5074_v50  ;;  %v3783_v14 = vpop.f32.mrf.mxu0  ;;  %v5077_v40 = vadd.f32 %v3832_v34, %v741_v0 }
 0x12b   : > { %v761_v60 = vadd.f32 %v3783_v14, %v4986_v46  ;;  %v1009_v23 = vpop.f32.mrf.mxu1 }
 0x12c   : > { %v750_v24 = vpop.f32.mrf.mxu0  ;;  %v5080_v19 = vadd.f32 %v1009_v23, %v731_v58 }
 0x12d   : > { %v751_v21 = vadd.f32 %v4986_v46, %v750_v24  ;;  %v3835_v36 = vpop.f32.mrf.mxu1 }
 0x12e   : > { %5581 = vst [vmem:[#allocation17_spill] sm:$0xff] %v5080_v19  ;;  %v5083_v2 = vpop.f32.mrf.mxu0  ;;  %v5085_v7 = vadd.f32 %v3835_v36, %v761_v60 }
 0x12f   : > { %v1021_v20 = vpop.f32.mrf.mxu1 }
 0x130   : > { %5582 = vst [vmem:[#allocation18_spill] sm:$0xff] %v5085_v7  ;;  %v5087_v38 = vpop.f32.mrf.mxu0  ;;  %v5089_v47 = vadd.f32 %v1021_v20, %v751_v21 }
 0x131   : > { %v5091_v43 = vpop.f32.mrf.mxu1 }
 0x132   : > { %5583 = vst [vmem:[#allocation19_spill] sm:$0xff] %v5089_v47  ;;  %v5093_v51 = vpop.f32.mrf.mxu0 }
 0x133   : > { %v5095_v63 = vpop.f32.mrf.mxu1 }
 0x134   : > { %v5097_v39 = vpop.f32.mrf.mxu0 }
 0x135   : > { %v5099_v53 = vpop.f32.mrf.mxu1 }
 0x136   : > { %v5101_v46 = vpop.f32.mrf.mxu0 }
 0x137   : > { %v5103_v62 = vpop.f32.mrf.mxu1 }
 0x138   : > { %v5105_v31 = vpop.f32.mrf.mxu0 }
 0x139   : > { %v5107_v10 = vpop.f32.mrf.mxu1 }
 0x13a   : > { %v5109_v41 = vpop.f32.mrf.mxu0 }
 0x13b   : > { %v5111_v57 = vpop.f32.mrf.mxu1 }
 0x13c   : > { %v5113_v30 = vpop.f32.mrf.mxu0 }
 0x13d   : > { %v5115_v26 = vpop.f32.mrf.mxu1 }
 0x13e   : > { %v5117_v56 = vpop.f32.mrf.mxu0 }
 0x13f   : > { %v5119_v15 = vpop.f32.mrf.mxu1 }
 0x140   : > { %v5121_v61 = vpop.f32.mrf.mxu0 }
 0x141   : > { %v5123_v59 = vpop.f32.mrf.mxu1 }
 0x142   : > { %v5125_v9 = vpop.f32.mrf.mxu0 }
 0x143   : > { %v5127_v0 = vpop.f32.mrf.mxu1 }
 0x144   : > { %v5129_v5 = vpop.f32.mrf.mxu0 }
 0x145   : > { %v5131_v17 = vpop.f32.mrf.mxu1 }
 0x146   : > { %v5133_v58 = vpop.f32.mrf.mxu0 }
 0x147   : > { %v5135_v34 = vpop.f32.mrf.mxu1 }
 0x148   : > { %v5137_v14 = vpop.f32.mrf.mxu0 }
 0x149   : > { %v5139_v60 = vpop.f32.mrf.mxu1 }
 0x14a   : > { %v5141_v23 = vpop.f32.mrf.mxu0 }
 0x14b   : > { %v5143_v24 = vpop.f32.mrf.mxu1 }
 0x14c   : > { %v5145_v21 = vpop.f32.mrf.mxu0 }
 0x14d   : > { %v5147_v36 = vpop.f32.mrf.mxu1 }
 0x14e   : > { %5584 = vst [vmem:[#allocation20_spill] sm:$0xff] %v5147_v36  ;;  %v5149_v20 = vpop.f32.mrf.mxu0 }
 0x14f   : > { %v5151_v47 = vpop.f32.mrf.mxu1 }
 0x150   : > { %5585 = vst [vmem:[#allocation21_spill] sm:$0xff] %v5151_v47  ;;  %v5153_v7 = vpop.f32.mrf.mxu0 }
 0x151   : > { %5586 = vst [vmem:[#allocation22_spill] sm:$0xff] %v5153_v7  ;;  %v5155_v19 = vpop.f32.mrf.mxu1 }
 0x152   : > { %5587 = vst [vmem:[#allocation8_spill] sm:$0xff] %v5155_v19  ;;  %v5157_v50 = vpop.f32.mrf.mxu0 }
 0x153   : > { %5588 = vst [vmem:[#allocation23_spill] sm:$0xff] %v5157_v50  ;;  %v5159_v18 = vpop.f32.mrf.mxu1 }
 0x154   : > { %5589 = vst [vmem:[#allocation24_spill] sm:$0xff] %v5159_v18  ;;  %v5161_v28 = vpop.f32.mrf.mxu0 }
 0x155   : > { %5590 = vst [vmem:[#allocation25_spill] sm:$0xff] %v5161_v28  ;;  %v5163_v11 = vpop.f32.mrf.mxu1 }
 0x156   : > { %5591 = vst [vmem:[#allocation26_spill] sm:$0xff] %v5163_v11  ;;  %v3872_v29 = vpop.f32.mrf.mxu0 }
 0x157   : > { %v1251_v55 = vadd.f32 %v3872_v29, %v5053_v48  ;;  %v5166_v6 = vpop.f32.mrf.mxu1 }
 0x158   : > { %5592 = vst [vmem:[#allocation27_spill] sm:$0xff] %v5166_v6  ;;  %v5168_v35 = vpop.f32.mrf.mxu0 }
 0x159   : > { %5593 = vst [vmem:[#allocation28_spill] sm:$0xff] %v5168_v35  ;;  %v3924_v47 = vpop.f32.mrf.mxu1 }
 0x15a   : > { %v5170_v22 = vpop.f32.mrf.mxu0  ;;  %v5172_v7 = vadd.f32 %v3924_v47, %v1251_v55 }
 0x15b   : > { %v5174_v19 = vpop.f32.mrf.mxu1 }
 0x15c   : > { %5594 = vst [vmem:[#allocation29_spill] sm:$0xff] %v5172_v7  ;;  %5595 = vst [vmem:[#allocation30_spill] sm:$0xff] %v5174_v19  ;;  %v5176_v50 = vpop.f32.mrf.mxu0 }
 0x15d   : > { %5596 = vst [vmem:[#allocation31_spill] sm:$0xff] %v5176_v50  ;;  %v5178_v18 = vpop.f32.mrf.mxu1 }
 0x15e   : > { %5597 = vst [vmem:[#allocation32_spill] sm:$0xff] %v5178_v18  ;;  %v3878_v28 = vpop.f32.mrf.mxu0 }
 0x15f   : > { %v1279_v11 = vadd.f32 %v3878_v28, %v5065_v42  ;;  %v5181_v36 = vpop.f32.mrf.mxu1 }
 0x160   : > { %5598 = vst [vmem:[#allocation33_spill] sm:$0xff] %v5181_v36  ;;  %v5183_v48 = vpop.f32.mrf.mxu0 }
 0x161   : > { %5599 = vst [vmem:[#allocation34_spill] sm:$0xff] %v5183_v48  ;;  %v3930_v29 = vpop.f32.mrf.mxu1 }
 0x162   : > { %v5185_v6 = vpop.f32.mrf.mxu0  ;;  %v5187_v35 = vadd.f32 %v3930_v29, %v1279_v11  ;;  %v1111_v11 = vadd.f32 %v5083_v2, %v4994_v52  ;;  %v1132_v52 = vadd.f32 %v5105_v31, %v5008_v13  ;;  %v1153_v2 = vadd.f32 %v5109_v41, %v5011_v27 }
 0x163   : > { %v5189_v55 = vpop.f32.mrf.mxu1  ;;  %v1167_v13 = vadd.f32 %v5117_v56, %v5017_v4  ;;  %v1174_v4 = vadd.f32 %v5129_v5, %v5026_v8 }
 0x164   : > { %5600 = vst [vmem:[#allocation35_spill] sm:$0xff] %v5187_v35  ;;  %v5191_v47 = vpop.f32.mrf.mxu0  ;;  %v1104_v35 = vadd.f32 %v5087_v38, %v4997_v3  ;;  %v5235_v27 = vadd.f32 %v5115_v26, %v1153_v2 }
 0x165   : > { %v5193_v7 = vpop.f32.mrf.mxu1  ;;  %v5247_v31 = vadd.f32 %v5123_v59, %v1167_v13  ;;  %v5610_v13 = vld [vmem:[#allocation24_spill] sm:$0xff] }
 0x166   : > { %v3884_v50 = vpop.f32.mrf.mxu0 }
 0x167   : > { %v1307_v18 = vadd.f32 %v3884_v50, %v5077_v40  ;;  %v5196_v19 = vpop.f32.mrf.mxu1  ;;  %v1125_v50 = vadd.f32 %v5093_v51, %v4999_v49  ;;  %v1118_v40 = vadd.f32 %v5097_v39, %v5002_v25  ;;  %v1396_v49 = vadd.f32 %v5095_v63, %v1104_v35 }
 0x168   : > { %v5198_v42 = vpop.f32.mrf.mxu0  ;;  %v1428_v39 = vadd.f32 %v5111_v57, %v1132_v52  ;;  %v1160_v35 = vadd.f32 %v5121_v61, %v5020_v45  ;;  %v1188_v45 = vadd.f32 %v5137_v14, %v5032_v1  ;;  %v4123_v57 = vld [vmem:[%s5442_s2 + $0x4] ss:$16 sps:$4 sm:$0xff]   ;;  %v5268_v1 = vadd.f32 %v5135_v34, %v1174_v4 }
 0x169   : > { %5601 = vst [vmem:[#allocation36_spill] sm:$0xff] %v5198_v42  ;;  %v3936_v28 = vpop.f32.mrf.mxu1  ;;  %v1420_v38 = vadd.f32 %v5099_v53, %v1125_v50  ;;  %v1412_v25 = vadd.f32 %v5103_v62, %v1118_v40  ;;  %2961 = vmatprep.mubr.bf16.mxu0 %v4123_v57  ;;  %v3013_v34 = vld [vmem:[%s5443_s3] sm:$0xff]  ;;  %v1223_v14 = vadd.f32 %v5149_v20, %v5041_v16  ;;  %v4253_v50 = vmov 0   ;;  %v5608_v16 = vld [vmem:[#allocation23_spill] sm:$0xff] }
 0x16a   : > { %v5200_v36 = vpop.f32.mrf.mxu0  ;;  %v5202_v48 = vadd.f32 %v3936_v28, %v1307_v18  ;;  %v1139_v18 = vadd.f32 %v5101_v46, %v5005_v37  ;;  %v5276_v59 = vadd.f32 %v5143_v24, %v1188_v45  ;;  %v5604_v24 = vld [vmem:[#allocation7_spill] sm:$0xff]  ;;  %4088 = vset.pattern.permute.xlu0 %v4253_v50  ;;  %v5612_v57 = vld [vmem:[#allocation25_spill] sm:$0xff] }
 0x16b   : > { %5602 = vst [vmem:[#allocation37_spill] sm:$0xff] %v5200_v36  ;;  %v5206_v29 = vpop.f32.mrf.mxu1  ;;  %v1404_v36 = vadd.f32 %v5091_v43, %v1111_v11  ;;  %v1146_v43 = vadd.f32 %v5113_v30, %v5014_v54  ;;  %v1181_v54 = vadd.f32 %v5125_v9, %v5023_v12  ;;  %v5259_v12 = vadd.f32 %v5127_v0, %v1160_v35 }
 0x16c   : > { %v5214_v42 = vpop.f32.mrf.mxu0  ;;  %v1436_v37 = vadd.f32 %v5107_v10, %v1139_v18  ;;  %v1195_v10 = vadd.f32 %v5133_v58, %v5029_v44  ;;  %v4126_v44 = vld [vmem:[%s5442_s2 + $0xc] ss:$16 sps:$4 sm:$0xff]   ;;  %3017 = vperm.xlu0 %4088, %v3013_v34   ;;  %v5614_v34 = vld [vmem:[#allocation11_spill] sm:$0xff] }
 0x16d   : > { %v5223_v3 = vpop.f32.mrf.mxu1  ;;  %v5242_v63 = vadd.f32 %v5119_v15, %v1146_v43  ;;  %v5262_v30 = vadd.f32 %v5131_v17, %v1181_v54  ;;  %v1209_v15 = vadd.f32 %v5141_v23, %v5035_v32  ;;  %3002 = vmatprep.mubr.bf16.mxu1 %v4126_v44  ;;  %v1202_v32 = vadd.f32 %v5145_v21, %v5038_v33  ;;  %v5607_v21 = vld [vmem:[#allocation9_spill] sm:$0xff]  ;;  %v5609_v43 = vld [vmem:[#allocation8_spill] sm:$0xff] }
 0x16e   : > { %v3946_v51 = vpop.f32.mrf.mxu0  ;;  %v5273_v61 = vadd.f32 %v5139_v60, %v1195_v10  ;;  %v5603_v60 = vld [vmem:[#allocation20_spill] sm:$0xff]  ;;  %v1237_v20 = vadd.f32 %v5608_v16, %v5607_v21 }
 0x16f   : > { %v5237_v46 = vpop.f32.mrf.mxu1  ;;  %v1727_v53 = vadd.f32 %v3946_v51, %v1404_v36  ;;  %v5286_v23 = vadd.f32 %v5603_v60, %v1209_v15  ;;  %v5605_v36 = vld [vmem:[#allocation22_spill] sm:$0xff]  ;;  %v5296_v51 = vadd.f32 %v5609_v43, %v1223_v14  ;;  %v5616_v60 = vld [vmem:[#allocation27_spill] sm:$0xff] }
 0x170   : > { %v1720_v62 = vpop.f32.mrf.mxu0  ;;  %v1216_v28 = vadd.f32 %v5605_v36, %v5604_v24 }
 0x171   : > { %v3998_v41 = vpop.f32.mrf.mxu1  ;;  %v1721_v26 = vadd.f32 %v1720_v62, %v1396_v49 }
 0x172   : > { %v3949_v56 = vpop.f32.mrf.mxu0  ;;  %v1986_v8 = vadd.f32 %v3998_v41, %v1727_v53  ;;  %v5299_v35 = vadd.f32 %v5610_v13, %v1216_v28  ;;  %v5611_v41 = vld [vmem:[#allocation10_spill] sm:$0xff] }
 0x173   : > { %v1979_v9 = vpop.f32.mrf.mxu1  ;;  %v1739_v0 = vadd.f32 %v3949_v56, %v1420_v38  ;;  %v5606_v38 = vld [vmem:[#allocation21_spill] sm:$0xff]  ;;  %v5613_v56 = vld [vmem:[#allocation26_spill] sm:$0xff] }
 0x174   : > { %v2170_v5 = vmax.f32 %v1986_v8, 0.0  ;;  %v1732_v17 = vpop.f32.mrf.mxu0  ;;  %v1980_v58 = vadd.f32 %v1979_v9, %v1721_v26  ;;  %v5291_v33 = vadd.f32 %v5606_v38, %v1202_v32  ;;  %v1230_v26 = vadd.f32 %v5612_v57, %v5611_v41  ;;  %v5615_v32 = vld [vmem:[#allocation28_spill] sm:$0xff] }
 0x175   : > { %v4001_v11 = vpop.f32.mrf.mxu1  ;;  %v1733_v18 = vadd.f32 %v1732_v17, %v1412_v25  ;;  %v3014_v25 = vld [vmem:[%s5443_s3 + $0x8] sm:$0xff]  ;;  %v5307_v8 = vadd.f32 %v5613_v56, %v1237_v20  ;;  %v1244_v14 = vadd.f32 %v5615_v32, %v5614_v34 }
 0x176   : > { %v2202_v40 = vmul.f32 -0.22222222, %v2170_v5  ;;  %v2169_v52 = vmax.f32 %v1980_v58, 0.0  ;;  %v3952_v2 = vpop.f32.mrf.mxu0  ;;  %v1998_v49 = vadd.f32 %v4001_v11, %v1739_v0  ;;  %3023 = vperm.xlu0 %4088, %v3014_v25   ;;  %v5312_v24 = vadd.f32 %v5616_v60, %v1230_v26  ;;  %v5620_v25 = vld [vmem:[#allocation31_spill] sm:$0xff]  ;;  %v5622_v56 = vld [vmem:[#allocation14_spill] sm:$0xff] }
 0x177   : > { %v1991_v54 = vpop.f32.mrf.mxu1  ;;  %v1751_v44 = vadd.f32 %v3952_v2, %v1436_v37  ;;  %v5618_v2 = vld [vmem:[#allocation30_spill] sm:$0xff] }
 0x178   : > { %v2235_v53 = vmul.f32 1.442695, %v2202_v40  ;;  %v2201_v62 = vmul.f32 -0.22222222, %v2169_v52  ;;  %v2172_v4 = vmax.f32 %v1998_v49, 0.0  ;;  %v1744_v10 = vpop.f32.mrf.mxu0  ;;  %v1992_v45 = vadd.f32 %v1991_v54, %v1733_v18  ;;  %v5617_v18 = vld [vmem:[#allocation12_spill] sm:$0xff] }
 0x179   : > { %v1745_v15 = vadd.f32 %v1744_v10, %v1428_v39  ;;  %v4004_v9 = vpop.f32.mrf.mxu1  ;;  %v1265_v52 = vadd.f32 %v5170_v22, %v5617_v18  ;;  %v5318_v49 = vadd.f32 %v5618_v2, %v1244_v14  ;;  %v5619_v54 = vld [vmem:[#allocation13_spill] sm:$0xff] }
 0x17a   : > { %4127 = vpow2.f32 %v2235_v53  ;;  %v2233_v0 = vmul.f32 1.442695, %v2201_v62  ;;  %v2204_v5 = vmul.f32 -0.22222222, %v2172_v4  ;;  %v2171_v17 = vmax.f32 %v1992_v45, 0.0  ;;  %v3955_v58 = vpop.f32.mrf.mxu0  ;;  %v5621_v62 = vld [vmem:[#allocation32_spill] sm:$0xff] }
 0x17b   : > { %v1763_v36 = vadd.f32 %v3955_v58, %v5235_v27  ;;  %v2010_v28 = vadd.f32 %v4004_v9, %v1751_v44  ;;  %v2003_v11 = vpop.f32.mrf.mxu1  ;;  %v1258_v53 = vadd.f32 %v5620_v25, %v5619_v54  ;;  %v5324_v4 = vadd.f32 %v5621_v62, %v1265_v52  ;;  %v5623_v44 = vld [vmem:[#allocation34_spill] sm:$0xff]  ;;  %v5624_v9 = vld [vmem:[#allocation33_spill] sm:$0xff]  ;;  %v5628_v54 = vld [vmem:[#allocation36_spill] sm:$0xff] }
 0x17c   : > { %4129 = vpow2.f32 %v2233_v0  ;;  %v2239_v37 = vmul.f32 1.442695, %v2204_v5  ;;  %v2203_v39 = vmul.f32 -0.22222222, %v2171_v17  ;;  %v1756_v50 = vpop.f32.mrf.mxu0  ;;  %v2004_v40 = vadd.f32 %v2003_v11, %v1745_v15  ;;  %v5625_v5 = vld [vmem:[#allocation15_spill] sm:$0xff] }
 0x17d   : > { %v2174_v38 = vmax.f32 %v2010_v28, 0.0  ;;  %v1757_v21 = vadd.f32 %v1756_v50, %v5242_v63  ;;  %v4007_v16 = vpop.f32.mrf.mxu1  ;;  %v1272_v15 = vadd.f32 %v5623_v44, %v5622_v56  ;;  %v5330_v0 = vadd.f32 %v5624_v9, %v1258_v53  ;;  %v5626_v28 = vld [vmem:[#allocation16_spill] sm:$0xff]  ;;  %v5629_v53 = vld [vmem:[#allocation18_spill] sm:$0xff] }
 0x17e   : > { %4131 = vpow2.f32 %v2239_v37  ;;  %v2237_v20 = vmul.f32 1.442695, %v2203_v39  ;;  %v2173_v27 = vmax.f32 %v2004_v40, 0.0  ;;  %v3958_v43 = vpop.f32.mrf.mxu0  ;;  %v2022_v13 = vadd.f32 %v4007_v16, %v1763_v36 }
 0x17f   : > { %v2206_v10 = vmul.f32 -0.22222222, %v2174_v38  ;;  %v1775_v22 = vadd.f32 %v3958_v43, %v5247_v31  ;;  %v2015_v45 = vpop.f32.mrf.mxu1  ;;  %v1293_v17 = vadd.f32 %v5185_v6, %v5625_v5  ;;  %v1286_v11 = vadd.f32 %v5191_v47, %v5626_v28 }
 0x180   : > { %4133 = vpow2.f32 %v2237_v20  ;;  %v2205_v41 = vmul.f32 -0.22222222, %v2173_v27  ;;  %v2176_v57 = vmax.f32 %v2022_v13, 0.0  ;;  %v1768_v63 = vpop.f32.mrf.mxu0  ;;  %v2016_v26 = vadd.f32 %v2015_v45, %v1757_v21  ;;  %v5627_v13 = vld [vmem:[#allocation17_spill] sm:$0xff] }
 0x181   : > { %v2243_v58 = vmul.f32 1.442695, %v2206_v10  ;;  %v4010_v34 = vpop.f32.mrf.mxu1  ;;  %v1769_v37 = vadd.f32 %v1768_v63, %v5259_v12  ;;  %v5339_v2 = vadd.f32 %v5189_v55, %v1272_v15  ;;  %v5342_v38 = vadd.f32 %v5193_v7, %v1293_v17  ;;  %v5630_v55 = vld [vmem:[#allocation37_spill] sm:$0xff] }
 0x182   : > { %v2241_v32 = vmul.f32 1.442695, %v2205_v41  ;;  %v2208_v14 = vmul.f32 -0.22222222, %v2176_v57  ;;  %v2175_v31 = vmax.f32 %v2016_v26, 0.0  ;;  %v3961_v60 = vpop.f32.mrf.mxu0  ;;  %v2034_v36 = vadd.f32 %v4010_v34, %v1775_v22 }
 0x183   : > { %4135 = vpow2.f32 %v2243_v58  ;;  %v1787_v39 = vadd.f32 %v3961_v60, %v5262_v30  ;;  %v2027_v50 = vpop.f32.mrf.mxu1  ;;  %v5345_v21 = vadd.f32 %v5196_v19, %v1286_v11  ;;  %v1300_v25 = vadd.f32 %v5628_v54, %v5627_v13  ;;  %v5631_v54 = vld [vmem:[#allocation19_spill] sm:$0xff] }
 0x184   : > { %4137 = vpow2.f32 %v2241_v32  ;;  %v2247_v40 = vmul.f32 1.442695, %v2208_v14  ;;  %v2207_v18 = vmul.f32 -0.22222222, %v2175_v31  ;;  %v2178_v6 = vmax.f32 %v2034_v36, 0.0  ;;  %v1780_v52 = vpop.f32.mrf.mxu0 }
 0x185   : > { %v2028_v47 = vadd.f32 %v2027_v50, %v1769_v37  ;;  %v4013_v16 = vpop.f32.mrf.mxu1  ;;  %v5351_v62 = vadd.f32 %v5630_v55, %v5629_v53  ;;  %v1781_v7 = vadd.f32 %v1780_v52, %v5268_v1  ;;  %v5363_v53 = vadd.f32 %v5214_v42, %v5631_v54 }
 0x186   : > { %4139 = vpow2.f32 %v2247_v40  ;;  %v2245_v12 = vmul.f32 1.442695, %v2207_v18  ;;  %v2210_v30 = vmul.f32 -0.22222222, %v2178_v6  ;;  %v3964_v20 = vpop.f32.mrf.mxu0  ;;  %v2046_v27 = vadd.f32 %v4013_v16, %v1787_v39 }
 0x187   : > { %v4128_v43 = vpop.eup %4127  ;;  %v2177_v10 = vmax.f32 %v2028_v47, 0.0  ;;  %v2039_v19 = vpop.f32.mrf.mxu1  ;;  %v1799_v45 = vadd.f32 %v3964_v20, %v5273_v61 }
 0x188   : > { %4141 = vpow2.f32 %v2245_v12  ;;  %v2251_v22 = vmul.f32 1.442695, %v2210_v30  ;;  %v2180_v41 = vmax.f32 %v2046_v27, 0.0  ;;  %v1792_v57 = vpop.f32.mrf.mxu0  ;;  %v2458_v26 = vmul.f32 %v4128_v43, %v4128_v43 }
 0x189   : > { %v4130_v63 = vpop.eup %4129  ;;  %v2209_v56 = vmul.f32 -0.22222222, %v2177_v10  ;;  %v1793_v44 = vadd.f32 %v1792_v57, %v5276_v59  ;;  %v2040_v15 = vadd.f32 %v2039_v19, %v1781_v7  ;;  %v4016_v9 = vpop.f32.mrf.mxu1  ;;  %v5359_v12 = vadd.f32 %v5206_v29, %v1300_v25 }
 0x18a   : > { %v3296_v5 = vpack.c.bf16 %v4128_v43, %v4130_v63  ;;  %v2457_v17 = vmul.f32 %v4130_v63, %v4130_v63  ;;  %4143 = vpow2.f32 %v2251_v22  ;;  %v2212_v58 = vmul.f32 -0.22222222, %v2180_v41  ;;  %v3967_v1 = vpop.f32.mrf.mxu0 }
 0x18b   : > { %v4132_v34 = vpop.eup %4131  ;;  %v2249_v32 = vmul.f32 1.442695, %v2209_v56  ;;  %v2179_v14 = vmax.f32 %v2040_v15, 0.0  ;;  %v1811_v31 = vadd.f32 %v3967_v1, %v5286_v23  ;;  %v2058_v61 = vadd.f32 %v4016_v9, %v1799_v45  ;;  %v2051_v60 = vpop.f32.mrf.mxu1 }
 0x18c   : > { %3297 = vst [vmem:[#allocation2] sm:$0xff] %v3296_v5   ;;  %v3376_v36 = vpack.c.bf16 %v2458_v26, %v2457_v17  ;;  %v2460_v28 = vmul.f32 %v4132_v34, %v4132_v34  ;;  %v2255_v11 = vmul.f32 1.442695, %v2212_v58  ;;  %v1804_v37 = vpop.f32.mrf.mxu0  ;;  %v2052_v59 = vadd.f32 %v2051_v60, %v1793_v44 }
 0x18d   : > { %v4134_v39 = vpop.eup %4133  ;;  %4145 = vpow2.f32 %v2249_v32  ;;  %v2211_v50 = vmul.f32 -0.22222222, %v2179_v14  ;;  %v2182_v40 = vmax.f32 %v2058_v61, 0.0  ;;  %v1805_v18 = vadd.f32 %v1804_v37, %v5291_v33  ;;  %v4019_v6 = vpop.f32.mrf.mxu1 }
 0x18e   : > { %3468 = vst [vmem:[#allocation2 + $0x80] sm:$0xff] %v3376_v36   ;;  %v3301_v52 = vpack.c.bf16 %v4132_v34, %v4134_v39  ;;  %v2459_v47 = vmul.f32 %v4134_v39, %v4134_v39  ;;  %4147 = vpow2.f32 %v2255_v11  ;;  %v2181_v23 = vmax.f32 %v2052_v59, 0.0  ;;  %v3970_v16 = vpop.f32.mrf.mxu0 }
 0x18f   : > { %v2253_v30 = vmul.f32 1.442695, %v2211_v50  ;;  %v2214_v20 = vmul.f32 -0.22222222, %v2182_v40  ;;  %v2070_v27 = vadd.f32 %v4019_v6, %v1811_v31  ;;  %v2063_v43 = vpop.f32.mrf.mxu1  ;;  %v1823_v29 = vadd.f32 %v3970_v16, %v5296_v51 }
 0x190   : > { %v4136_v13 = vpop.eup %4135  ;;  %3453 = vst [vmem:[#allocation2 + $0x8] sm:$0xff] %v3301_v52   ;;  %v3381_v33 = vpack.c.bf16 %v2460_v28, %v2459_v47  ;;  %v2213_v55 = vmul.f32 -0.22222222, %v2181_v23  ;;  %v1816_v7 = vpop.f32.mrf.mxu0  ;;  %v2064_v10 = vadd.f32 %v2063_v43, %v1805_v18  ;;  %v5632_v52 = vld [vmem:[#allocation29_spill] sm:$0xff] }
 0x191   : > { %v4138_v19 = vpop.eup %4137  ;;  %4149 = vpow2.f32 %v2253_v30  ;;  %v2259_v22 = vmul.f32 1.442695, %v2214_v20  ;;  %v2184_v25 = vmax.f32 %v2070_v27, 0.0  ;;  %v4022_v45 = vpop.f32.mrf.mxu1  ;;  %v2462_v41 = vmul.f32 %v4136_v13, %v4136_v13 }
 0x192   : > { %3469 = vst [vmem:[#allocation2 + $0x88] sm:$0xff] %v3381_v33   ;;  %v3306_v57 = vpack.c.bf16 %v4136_v13, %v4138_v19  ;;  %v2461_v63 = vmul.f32 %v4138_v19, %v4138_v19  ;;  %v2257_v26 = vmul.f32 1.442695, %v2213_v55  ;;  %v3973_v56 = vpop.f32.mrf.mxu0  ;;  %v1817_v15 = vadd.f32 %v1816_v7, %v5299_v35 }
 0x193   : > { %v4140_v42 = vpop.eup %4139  ;;  %4151 = vpow2.f32 %v2259_v22  ;;  %v2216_v44 = vmul.f32 -0.22222222, %v2184_v25  ;;  %v2183_v9 = vmax.f32 %v2064_v10, 0.0  ;;  %v2075_v5 = vpop.f32.mrf.mxu1  ;;  %v1835_v51 = vadd.f32 %v3973_v56, %v5307_v8 }
 0x194   : > { %3454 = vst [vmem:[#allocation2 + $0x10] sm:$0xff] %v3306_v57   ;;  %v3386_v17 = vpack.c.bf16 %v2462_v41, %v2461_v63  ;;  %4153 = vpow2.f32 %v2257_v26  ;;  %v2082_v58 = vadd.f32 %v4022_v45, %v1823_v29  ;;  %v1828_v1 = vpop.f32.mrf.mxu0  ;;  %v2464_v32 = vmul.f32 %v4140_v42, %v4140_v42 }
 0x195   : > { %v4142_v34 = vpop.eup %4141  ;;  %v2263_v14 = vmul.f32 1.442695, %v2216_v44  ;;  %v2215_v31 = vmul.f32 -0.22222222, %v2183_v9  ;;  %v2076_v61 = vadd.f32 %v2075_v5, %v1817_v15  ;;  %v4025_v60 = vpop.f32.mrf.mxu1  ;;  %v1829_v50 = vadd.f32 %v1828_v1, %v5312_v24 }
 0x196   : > { %3470 = vst [vmem:[#allocation2 + $0x90] sm:$0xff] %v3386_v17   ;;  %v3311_v36 = vpack.c.bf16 %v4140_v42, %v4142_v34  ;;  %v2463_v28 = vmul.f32 %v4142_v34, %v4142_v34  ;;  %v2186_v11 = vmax.f32 %v2082_v58, 0.0  ;;  %v3976_v35 = vpop.f32.mrf.mxu0  ;;  %v2094_v37 = vadd.f32 %v4025_v60, %v1835_v51 }
 0x197   : > { %v4144_v59 = vpop.eup %4143  ;;  %4155 = vpow2.f32 %v2263_v14  ;;  %v2261_v39 = vmul.f32 1.442695, %v2215_v31  ;;  %v2185_v8 = vmax.f32 %v2076_v61, 0.0  ;;  %v2087_v40 = vpop.f32.mrf.mxu1  ;;  %v1847_v47 = vadd.f32 %v3976_v35, %v5632_v52  ;;  %v5633_v61 = vld [vmem:[#allocation35_spill] sm:$0xff] }
 0x198   : > { %3455 = vst [vmem:[#allocation2 + $0x18] sm:$0xff] %v3311_v36   ;;  %v3391_v18 = vpack.c.bf16 %v2464_v32, %v2463_v28  ;;  %v2218_v6 = vmul.f32 -0.22222222, %v2186_v11  ;;  %v2188_v23 = vmax.f32 %v2094_v37, 0.0  ;;  %v1840_v16 = vpop.f32.mrf.mxu0  ;;  %v2466_v30 = vmul.f32 %v4144_v59, %v4144_v59 }
 0x199   : > { %4157 = vpow2.f32 %v2261_v39  ;;  %v2217_v20 = vmul.f32 -0.22222222, %v2185_v8  ;;  %v2088_v27 = vadd.f32 %v2087_v40, %v1829_v50  ;;  %v4028_v43 = vpop.f32.mrf.mxu1  ;;  %v1841_v24 = vadd.f32 %v1840_v16, %v5318_v49 }
 0x19a   : > { %v4146_v13 = vpop.eup %4145  ;;  %3471 = vst [vmem:[#allocation2 + $0x98] sm:$0xff] %v3391_v18   ;;  %v2267_v54 = vmul.f32 1.442695, %v2218_v6  ;;  %v2220_v33 = vmul.f32 -0.22222222, %v2188_v23  ;;  %v3979_v55 = vpop.f32.mrf.mxu0  ;;  %v2106_v7 = vadd.f32 %v4028_v43, %v1847_v47 }
 0x19b   : > { %v4148_v10 = vpop.eup %4147  ;;  %v3316_v19 = vpack.c.bf16 %v4144_v59, %v4146_v13  ;;  %v2465_v22 = vmul.f32 %v4146_v13, %v4146_v13  ;;  %v2265_v29 = vmul.f32 1.442695, %v2217_v20  ;;  %v2187_v25 = vmax.f32 %v2088_v27, 0.0  ;;  %v2099_v45 = vpop.f32.mrf.mxu1 }
 0x19c   : > { %v2468_v41 = vmul.f32 %v4148_v10, %v4148_v10  ;;  %4159 = vpow2.f32 %v2267_v54  ;;  %v2271_v57 = vmul.f32 1.442695, %v2220_v33  ;;  %v1859_v63 = vadd.f32 %v3979_v55, %v5324_v4  ;;  %v1852_v26 = vpop.f32.mrf.mxu0 }
 0x19d   : > { %3456 = vst [vmem:[#allocation2 + $0x20] sm:$0xff] %v3316_v19   ;;  %v3396_v56 = vpack.c.bf16 %v2466_v30, %v2465_v22  ;;  %4161 = vpow2.f32 %v2265_v29  ;;  %v2219_v42 = vmul.f32 -0.22222222, %v2187_v25  ;;  %v2190_v44 = vmax.f32 %v2106_v7, 0.0  ;;  %v4031_v49 = vpop.f32.mrf.mxu1 }
 0x19e   : > { %v4150_v15 = vpop.eup %4149  ;;  %4163 = vpow2.f32 %v2271_v57  ;;  %v1853_v9 = vadd.f32 %v1852_v26, %v5330_v0  ;;  %v2100_v5 = vadd.f32 %v2099_v45, %v1841_v24  ;;  %v3982_v17 = vpop.f32.mrf.mxu0  ;;  %v2118_v51 = vadd.f32 %v4031_v49, %v1859_v63 }
 0x19f   : > { %3472 = vst [vmem:[#allocation2 + $0xa0] sm:$0xff] %v3396_v56   ;;  %v3321_v58 = vpack.c.bf16 %v4148_v10, %v4150_v15  ;;  %v2467_v1 = vmul.f32 %v4150_v15, %v4150_v15  ;;  %v2269_v34 = vmul.f32 1.442695, %v2219_v42  ;;  %v2222_v32 = vmul.f32 -0.22222222, %v2190_v44  ;;  %v2111_v4 = vpop.f32.mrf.mxu1 }
 0x1a0   : > { %v4152_v14 = vpop.eup %4151  ;;  %v2189_v31 = vmax.f32 %v2100_v5, 0.0  ;;  %v1871_v60 = vadd.f32 %v3982_v17, %v5633_v61  ;;  %v2192_v36 = vmax.f32 %v2118_v51, 0.0  ;;  %v1864_v28 = vpop.f32.mrf.mxu0  ;;  %v2112_v11 = vadd.f32 %v2111_v4, %v1853_v9 }
 0x1a1   : > { %v4154_v35 = vpop.eup %4153  ;;  %3457 = vst [vmem:[#allocation2 + $0x28] sm:$0xff] %v3321_v58   ;;  %v3401_v37 = vpack.c.bf16 %v2468_v41, %v2467_v1  ;;  %v2470_v0 = vmul.f32 %v4152_v14, %v4152_v14  ;;  %4165 = vpow2.f32 %v2269_v34  ;;  %v2275_v59 = vmul.f32 1.442695, %v2222_v32  ;;  %v4034_v39 = vpop.f32.mrf.mxu1 }
 0x1a2   : > { %v3326_v50 = vpack.c.bf16 %v4152_v14, %v4154_v35  ;;  %v2469_v8 = vmul.f32 %v4154_v35, %v4154_v35  ;;  %v2221_v40 = vmul.f32 -0.22222222, %v2189_v31  ;;  %v2224_v18 = vmul.f32 -0.22222222, %v2192_v36  ;;  %v3985_v6 = vpop.f32.mrf.mxu0 }
 0x1a3   : > { %3473 = vst [vmem:[#allocation2 + $0xa8] sm:$0xff] %v3401_v37   ;;  %4167 = vpow2.f32 %v2275_v59  ;;  %v1865_v52 = vadd.f32 %v1864_v28, %v5339_v2  ;;  %v2191_v47 = vmax.f32 %v2112_v11, 0.0  ;;  %v1883_v23 = vadd.f32 %v3985_v6, %v5342_v38  ;;  %v2123_v16 = vpop.f32.mrf.mxu1 }
 0x1a4   : > { %v4156_v30 = vpop.eup %4155  ;;  %3458 = vst [vmem:[#allocation2 + $0x30] sm:$0xff] %v3326_v50   ;;  %v3406_v20 = vpack.c.bf16 %v2470_v0, %v2469_v8  ;;  %v2273_v27 = vmul.f32 1.442695, %v2221_v40  ;;  %v2279_v43 = vmul.f32 1.442695, %v2224_v18  ;;  %v2130_v13 = vadd.f32 %v4034_v39, %v1871_v60  ;;  %v1876_v54 = vpop.f32.mrf.mxu0 }
 0x1a5   : > { %v1644_v33 = vadd.f32 %v5223_v3, %v5351_v62  ;;  %v2472_v24 = vmul.f32 %v4156_v30, %v4156_v30  ;;  %v2223_v55 = vmul.f32 -0.22222222, %v2191_v47  ;;  %v2124_v7 = vadd.f32 %v2123_v16, %v1865_v52  ;;  %v4037_v10 = vpop.f32.mrf.mxu1 }
 0x1a6   : > { %v4158_v19 = vpop.eup %4157  ;;  %3474 = vst [vmem:[#allocation2 + $0xb0] sm:$0xff] %v3406_v20   ;;  %4169 = vpow2.f32 %v2273_v27  ;;  %v2194_v2 = vmax.f32 %v2130_v13, 0.0  ;;  %v1877_v38 = vadd.f32 %v1876_v54, %v5345_v21  ;;  %v3988_v22 = vpop.f32.mrf.mxu0  ;;  %v2142_v29 = vadd.f32 %v4037_v10, %v1883_v23 }
 0x1a7   : > { %v3331_v25 = vpack.c.bf16 %v4156_v30, %v4158_v19  ;;  %v2471_v45 = vmul.f32 %v4158_v19, %v4158_v19  ;;  %4171 = vpow2.f32 %v2279_v43  ;;  %v2277_v41 = vmul.f32 1.442695, %v2223_v55  ;;  %v2135_v57 = vpop.f32.mrf.mxu1 }
 0x1a8   : > { %v1636_v3 = vadd.f32 %v5237_v46, %v5363_v53  ;;  %v2226_v62 = vmul.f32 -0.22222222, %v2194_v2  ;;  %v2193_v63 = vmax.f32 %v2124_v7, 0.0  ;;  %v2196_v26 = vmax.f32 %v2142_v29, 0.0  ;;  %v1888_v56 = vpop.f32.mrf.mxu0 }
 0x1a9   : > { %v4160_v42 = vpop.eup %4159  ;;  %3459 = vst [vmem:[#allocation2 + $0x38] sm:$0xff] %v3331_v25   ;;  %v3411_v44 = vpack.c.bf16 %v2472_v24, %v2471_v45  ;;  %4173 = vpow2.f32 %v2277_v41  ;;  %v1895_v21 = vadd.f32 %v3988_v22, %v5202_v48  ;;  %v2136_v49 = vadd.f32 %v2135_v57, %v1877_v38  ;;  %v4040_v15 = vpop.f32.mrf.mxu1 }
 0x1aa   : > { %v4162_v9 = vpop.eup %4161  ;;  %v2283_v5 = vmul.f32 1.442695, %v2226_v62  ;;  %v2225_v17 = vmul.f32 -0.22222222, %v2193_v63  ;;  %v2228_v51 = vmul.f32 -0.22222222, %v2196_v26  ;;  %v1889_v58 = vadd.f32 %v1888_v56, %v5359_v12  ;;  %v3991_v1 = vpop.f32.mrf.mxu0 }
 0x1ab   : > { %v4164_v46 = vpop.eup %4163  ;;  %3475 = vst [vmem:[#allocation2 + $0xb8] sm:$0xff] %v3411_v44   ;;  %v2474_v53 = vmul.f32 %v4160_v42, %v4160_v42  ;;  %v3336_v34 = vpack.c.bf16 %v4160_v42, %v4162_v9  ;;  %v2473_v32 = vmul.f32 %v4162_v9, %v4162_v9  ;;  %v2195_v4 = vmax.f32 %v2136_v49, 0.0  ;;  %v2147_v14 = vpop.f32.mrf.mxu1 }
 0x1ac   : > { %4175 = vpow2.f32 %v2283_v5  ;;  %v2281_v31 = vmul.f32 1.442695, %v2225_v17  ;;  %v2287_v61 = vmul.f32 1.442695, %v2228_v51  ;;  %v1907_v48 = vadd.f32 %v3991_v1, %v1644_v33  ;;  %v1900_v60 = vpop.f32.mrf.mxu0 }
 0x1ad   : > { %3460 = vst [vmem:[#allocation2 + $0x40] sm:$0xff] %v3336_v34   ;;  %v3416_v36 = vpack.c.bf16 %v2474_v53, %v2473_v32  ;;  %v2476_v28 = vmul.f32 %v4164_v46, %v4164_v46  ;;  %v2227_v11 = vmul.f32 -0.22222222, %v2195_v4  ;;  %v2154_v35 = vadd.f32 %v4040_v15, %v1895_v21  ;;  %v4043_v37 = vpop.f32.mrf.mxu1 }
 0x1ae   : > { %v4166_v12 = vpop.eup %4165  ;;  %4177 = vpow2.f32 %v2281_v31  ;;  %v1901_v0 = vadd.f32 %v1900_v60, %v1636_v3  ;;  %v2148_v59 = vadd.f32 %v2147_v14, %v1889_v58  ;;  %v2166_v39 = vadd.f32 %v4043_v37, %v1907_v48 }
 0x1af   : > { %3476 = vst [vmem:[#allocation2 + $0xc0] sm:$0xff] %v3416_v36   ;;  %v3341_v50 = vpack.c.bf16 %v4164_v46, %v4166_v12  ;;  %v2475_v8 = vmul.f32 %v4166_v12, %v4166_v12  ;;  %4179 = vpow2.f32 %v2287_v61  ;;  %v2285_v40 = vmul.f32 1.442695, %v2227_v11  ;;  %v2159_v18 = vpop.f32.mrf.mxu1  ;;  %v4095_v12 = vld [vmem:[#allocation2 + $0x30] sm:$0xff]  }
 0x1b0   : > { %v4168_v6 = vpop.eup %4167  ;;  %v2198_v52 = vmax.f32 %v2154_v35, 0.0  ;;  %v2197_v47 = vmax.f32 %v2148_v59, 0.0  ;;  %v2200_v23 = vmax.f32 %v2166_v39, 0.0  ;;  %v2160_v16 = vadd.f32 %v2159_v18, %v1901_v0  ;;  %v4090_v60 = vld [vmem:[#allocation2 + $0x38] sm:$0xff]   ;;  %v4097_v59 = vld [vmem:[#allocation2 + $0xb0] sm:$0xff]  }
 0x1b1   : > { %3461 = vst [vmem:[#allocation2 + $0x48] sm:$0xff] %v3341_v50   ;;  %v3421_v30 = vpack.c.bf16 %v2476_v28, %v2475_v8  ;;  %4181 = vpow2.f32 %v2285_v40  ;;  %v2478_v54 = vmul.f32 %v4168_v6, %v4168_v6  ;;  %v4099_v50 = vld [vmem:[#allocation2 + $0x28] sm:$0xff]  }
 0x1b2   : > { %v2230_v20 = vmul.f32 -0.22222222, %v2198_v52  ;;  %v2229_v27 = vmul.f32 -0.22222222, %v2197_v47  ;;  %v2232_v43 = vmul.f32 -0.22222222, %v2200_v23 }
 0x1b3   : > { %v4170_v13 = vpop.eup %4169  ;;  %3477 = vst [vmem:[#allocation2 + $0xc8] sm:$0xff] %v3421_v30   ;;  %v2199_v33 = vmax.f32 %v2160_v16, 0.0  ;;  %v4093_v35 = vld [vmem:[#allocation2 + $0xb8] sm:$0xff]   ;;  %v4101_v40 = vld [vmem:[#allocation2 + $0xa8] sm:$0xff]   ;;  %v4105_v47 = vld [vmem:[#allocation2 + $0xa0] sm:$0xff]  }
 0x1b4   : > { %v4172_v24 = vpop.eup %4171  ;;  %v3346_v55 = vpack.c.bf16 %v4168_v6, %v4170_v13  ;;  %v2477_v7 = vmul.f32 %v4170_v13, %v4170_v13  ;;  %v2291_v10 = vmul.f32 1.442695, %v2230_v20  ;;  %v2289_v19 = vmul.f32 1.442695, %v2229_v27  ;;  %v4103_v6 = vld [vmem:[#allocation2 + $0x20] sm:$0xff]   ;;  %v4107_v16 = vld [vmem:[#allocation2 + $0x18] sm:$0xff]  }
 0x1b5   : > { %v2295_v2 = vmul.f32 1.442695, %v2232_v43  ;;  %v2231_v38 = vmul.f32 -0.22222222, %v2199_v33  ;;  %v2480_v25 = vmul.f32 %v4172_v24, %v4172_v24  ;;  %v4109_v20 = vld [vmem:[#allocation2 + $0x98] sm:$0xff]   ;;  %v4111_v43 = vld [vmem:[#allocation2 + $0x10] sm:$0xff]  }
 0x1b6   : > { %v4174_v22 = vpop.eup %4173  ;;  %3462 = vst [vmem:[#allocation2 + $0x50] sm:$0xff] %v3346_v55   ;;  %v3426_v29 = vpack.c.bf16 %v2478_v54, %v2477_v7  ;;  %4183 = vpow2.f32 %v2291_v10  ;;  %v4113_v54 = vld [vmem:[#allocation2 + $0x90] sm:$0xff]   ;;  %v4116_v55 = vld [vmem:[#allocation2 + $0x40] sm:$0xff]   ;;  %v4117_v7 = vld [vmem:[#allocation2 + $0x88] sm:$0xff]  }
 0x1b7   : > { %v3351_v45 = vpack.c.bf16 %v4172_v24, %v4174_v22  ;;  %v2479_v41 = vmul.f32 %v4174_v22, %v4174_v22  ;;  %4185 = vpow2.f32 %v2289_v19  ;;  %v2293_v57 = vmul.f32 1.442695, %v2231_v38  ;;  %v4115_v24 = vld [vmem:[#allocation2 + $0x8] sm:$0xff]   ;;  %v4118_v10 = vld [vmem:[#allocation2 + $0xc0] sm:$0xff]  }
 0x1b8   : > { %3478 = vst [vmem:[#allocation2 + $0xd0] sm:$0xff] %v3426_v29   ;;  %4187 = vpow2.f32 %v2295_v2  ;;  %v4112_v13 = vld [vmem:[#allocation2 + $0x48] sm:$0xff]   ;;  %v4119_v19 = vld [vmem:[#allocation2] sm:$0xff]  }
 0x1b9   : > { %v4176_v3 = vpop.eup %4175  ;;  %3463 = vst [vmem:[#allocation2 + $0x58] sm:$0xff] %v3351_v45   ;;  %v3431_v62 = vpack.c.bf16 %v2480_v25, %v2479_v41  ;;  %4189 = vpow2.f32 %v2293_v57  ;;  %v4121_v2 = vld [vmem:[%s5442_s2] ss:$16 sps:$4 sm:$0xff]   ;;  %v4124_v22 = vld [vmem:[%s5442_s2 + $0x8] ss:$16 sps:$4 sm:$0xff]  }
 0x1ba   : > { %v2482_v56 = vmul.f32 %v4176_v3, %v4176_v3  ;;  %v4114_v33 = vld [vmem:[#allocation2 + $0xc8] sm:$0xff]   ;;  %v4120_v38 = vld [vmem:[#allocation2 + $0x80] sm:$0xff]  }
 0x1bb   : > { %v4178_v63 = vpop.eup %4177  ;;  %3479 = vst [vmem:[#allocation2 + $0xd8] sm:$0xff] %v3431_v62  }
 0x1bc   : > { %v4180_v26 = vpop.eup %4179  ;;  %v3356_v42 = vpack.c.bf16 %v4176_v3, %v4178_v63  ;;  %v2481_v44 = vmul.f32 %v4178_v63, %v4178_v63 }
 0x1bd   : > { %v2484_v15 = vmul.f32 %v4180_v26, %v4180_v26  ;;  %v4108_v30 = vld [vmem:[#allocation2 + $0x50] sm:$0xff]  }
 0x1be   : > { %v4182_v21 = vpop.eup %4181  ;;  %3464 = vst [vmem:[#allocation2 + $0x60] sm:$0xff] %v3356_v42   ;;  %v3436_v49 = vpack.c.bf16 %v2482_v56, %v2481_v44 }
 0x1bf   : > { %v3361_v9 = vpack.c.bf16 %v4180_v26, %v4182_v21  ;;  %v2483_v5 = vmul.f32 %v4182_v21, %v4182_v21  ;;  %v4110_v27 = vld [vmem:[#allocation2 + $0xd0] sm:$0xff]  }
 0x1c0   : > { %3480 = vst [vmem:[#allocation2 + $0xe0] sm:$0xff] %v3436_v49   ;;  %v4104_v52 = vld [vmem:[#allocation2 + $0x58] sm:$0xff]  }
 0x1c1   : > { %3465 = vst [vmem:[#allocation2 + $0x68] sm:$0xff] %v3361_v9   ;;  %v3441_v17 = vpack.c.bf16 %v2484_v15, %v2483_v5 }
 0x1c2   : > { %v4106_v23 = vld [vmem:[#allocation2 + $0xd8] sm:$0xff]  }
 0x1c3   : > { %v4184_v51 = vpop.eup %4183  ;;  %3481 = vst [vmem:[#allocation2 + $0xe8] sm:$0xff] %v3441_v17  }
 0x1c4   : > { %v4186_v58 = vpop.eup %4185  ;;  %v2486_v46 = vmul.f32 %v4184_v51, %v4184_v51 }
 0x1c5   : > { %v4188_v1 = vpop.eup %4187  ;;  %v3366_v53 = vpack.c.bf16 %v4184_v51, %v4186_v58  ;;  %v2485_v34 = vmul.f32 %v4186_v58, %v4186_v58  ;;  %v4100_v8 = vld [vmem:[#allocation2 + $0x60] sm:$0xff]  }
 0x1c6   : > { %v4190_v32 = vpop.eup %4189  ;;  %v2488_v14 = vmul.f32 %v4188_v1, %v4188_v1 }
 0x1c7   : > { %3466 = vst [vmem:[#allocation2 + $0x70] sm:$0xff] %v3366_v53   ;;  %v3446_v4 = vpack.c.bf16 %v2486_v46, %v2485_v34  ;;  %v3371_v31 = vpack.c.bf16 %v4188_v1, %v4190_v32  ;;  %v2487_v61 = vmul.f32 %v4190_v32, %v4190_v32  ;;  %v4102_v18 = vld [vmem:[#allocation2 + $0xe0] sm:$0xff]  }
 0x1c8   : > { %v4096_v0 = vld [vmem:[#allocation2 + $0x68] sm:$0xff]  }
 0x1c9   : > { %3482 = vst [vmem:[#allocation2 + $0xf0] sm:$0xff] %v3446_v4   ;;  %3467 = vst [vmem:[#allocation2 + $0x78] sm:$0xff] %v3371_v31   ;;  %v3451_v48 = vpack.c.bf16 %v2488_v14, %v2487_v61 }
 0x1ca   : > { %v4098_v39 = vld [vmem:[#allocation2 + $0xe8] sm:$0xff]  }
 0x1cb   : > { %3483 = vst [vmem:[#allocation2 + $0xf8] sm:$0xff] %v3451_v48  }
 0x1ce   : > { %v4091_v28 = vld [vmem:[#allocation2 + $0x70] sm:$0xff]  }
 0x1d0   : > { %v4089_v36 = vld [vmem:[#allocation2 + $0x78] sm:$0xff]   ;;  %v4094_v37 = vld [vmem:[#allocation2 + $0xf0] sm:$0xff]  }
 0x1d1   : > { %3688 = vmatprep.subr.bf16.mxu0 %v4089_v36 }
 0x1d2   : > { %v4092_v11 = vld [vmem:[#allocation2 + $0xf8] sm:$0xff]   ;;  %3689 = vmatpush3.bf16.msra.mxu0 %v4090_v60 }
 0x1d3   : > { %3690 = vmatprep.subr.bf16.mxu0 %v4091_v28  ;;  %3710 = vmatprep.subr.bf16.mxu1 %v4092_v11 }
 0x1d4   : > { %3711 = vmatpush3.bf16.msra.mxu1 %v4093_v35 }
 0x1d5   : > { %3712 = vmatprep.subr.bf16.mxu1 %v4094_v37 }
 0x1d6   : > { %3691 = vmatpush3.bf16.msra.mxu0 %v4095_v12 }
 0x1d7   : > { %3692 = vmatprep.subr.bf16.mxu0 %v4096_v0 }
 0x1d8   : > { %3713 = vmatpush3.bf16.msra.mxu1 %v4097_v59 }
 0x1d9   : > { %3714 = vmatprep.subr.bf16.mxu1 %v4098_v39 }
 0x1da   : > { %3693 = vmatpush3.bf16.msra.mxu0 %v4099_v50 }
 0x1db   : > { %3694 = vmatprep.subr.bf16.mxu0 %v4100_v8 }
 0x1dc   : > { %3715 = vmatpush3.bf16.msra.mxu1 %v4101_v40 }
 0x1dd   : > { %3716 = vmatprep.subr.bf16.mxu1 %v4102_v18 }
 0x1de   : > { %3695 = vmatpush3.bf16.msra.mxu0 %v4103_v6 }
 0x1df   : > { %3696 = vmatprep.subr.bf16.mxu0 %v4104_v52 }
 0x1e0   : > { %3717 = vmatpush3.bf16.msra.mxu1 %v4105_v47 }
 0x1e1   : > { %3718 = vmatprep.subr.bf16.mxu1 %v4106_v23 }
 0x1e2   : > { %3697 = vmatpush3.bf16.msra.mxu0 %v4107_v16 }
 0x1e3   : > { %3698 = vmatprep.subr.bf16.mxu0 %v4108_v30 }
 0x1e4   : > { %3719 = vmatpush3.bf16.msra.mxu1 %v4109_v20 }
 0x1e5   : > { %3720 = vmatprep.subr.bf16.mxu1 %v4110_v27 }
 0x1e6   : > { %3699 = vmatpush3.bf16.msra.mxu0 %v4111_v43 }
 0x1e7   : > { %3700 = vmatprep.subr.bf16.mxu0 %v4112_v13  ;;  %v3018_v41 = vpop.permute.xlu0 %3017 }
 0x1e8   : > { %3721 = vmatpush3.bf16.msra.mxu1 %v4113_v54 }
 0x1e9   : > { %3722 = vmatprep.subr.bf16.mxu1 %v4114_v33 }
 0x1ea   : > { %3701 = vmatpush3.bf16.msra.mxu0 %v4115_v24 }
 0x1eb   : > { %3702 = vmatprep.subr.bf16.mxu0 %v4116_v55 }
 0x1ec   : > { %3723 = vmatpush3.bf16.msra.mxu1 %v4117_v7 }
 0x1ed   : > { %3724 = vmatprep.subr.bf16.mxu1 %v4118_v10 }
 0x1ee   : > { %3703 = vmatpush3.bf16.msra.mxu0 %v4119_v19 }
 0x1f0   : > { %3725 = vmatpush3.bf16.msra.mxu1 %v4120_v38 }
 0x1f1   : > { %2962 = vmatmul.mubr.bf16.vlgmr.msra.gmra.mxu0 %v4121_v2  ;;  %v3024_v9 = vpop.permute.xlu0 %3023 }
 0x1f3   : > { %3003 = vmatmul.mubr.bf16.vlgmr.msra.gmra.mxu1 %v4124_v22 }
 0x2b1   : > { %v3704_v29 = vpop.f32.mrf.mxu0 }
 0x2b3   : > { %v3726_v25 = vpop.f32.mrf.mxu1  ;;  %v3705_v45 = vpop.f32.mrf.mxu0 }
 0x2b4   : > { %v3706_v62 = vadd.f32 %v3705_v45, %v3704_v29 }
 0x2b5   : > { %v3727_v57 = vpop.f32.mrf.mxu1  ;;  %v3707_v3 = vpop.f32.mrf.mxu0 }
 0x2b6   : > { %v3728_v63 = vadd.f32 %v3727_v57, %v3726_v25 }
 0x2b7   : > { %v3729_v26 = vpop.f32.mrf.mxu1  ;;  %v3708_v56 = vpop.f32.mrf.mxu0 }
 0x2b8   : > { %v3005_v42 = vadd.f32 %v3728_v63, %v3706_v62  ;;  %v3709_v49 = vadd.f32 %v3708_v56, %v3707_v3 }
 0x2b9   : > { %v3730_v44 = vpop.f32.mrf.mxu1 }
 0x2ba   : > { %v3020_v21 = vsub.f32 %v3018_v41, %v3005_v42  ;;  %3034 = vst [vmem:[%s234_s7] sm:$0xff] %v3005_v42  ;;  %v3731_v15 = vadd.f32 %v3730_v44, %v3729_v26 }
 0x2bc   : > { %v3026_v5 = vmul.f32 %v3024_v9, %v3020_v21  ;;  %v3008_v17 = vadd.f32 %v3731_v15, %v3709_v49 }
 0x2be   : > { %v3027_v51 = vmul.f32 %v3026_v5, %v3020_v21  ;;  %v3011_v58 = vsub.f32 1.0, %v3008_v17 }
 0x2c0   : > { %v3028_v1 = vrot.slane %v3027_v51, 4  ;;  %v3012_v46 = vmax.f32 %v3011_v58, 0.0 }
 0x2c2   : > { %v3029_v53 = vadd.f32 %v3028_v1, %v3027_v51  ;;  %3035 = vst [vmem:[%s234_s7 + $0x8] sm:$0xff] %v3012_v46 }
 0x2c4   : > { %v3030_v34 = vrot.slane %v3029_v53, 2 }
 0x2c6   : > { %v3031_v32 = vadd.f32 %v3030_v34, %v3029_v53 }
 0x2c8   : > { %v3032_v4 = vrot.slane %v3031_v32, 1 }
 0x2ca   : > { %v3033_v14 = vadd.f32 %v3032_v4, %v3031_v32 }
 0x2cc   : > { %3036 = vst [vmem:[%s234_s7 + $0x10] sm:$0xff] %v3033_v14 }
 0x2cd   : > { %4204 = shalt.err (!%p4201_p5)
}
 0x2ce   : > { %s4205_s27 = scalar_lea.hbm %s5397_s13, 384  ;;  %s4209_s30 = scalar_lea.hbm %s5444_s4, 768 }
 0x2cf   : > { %p4206_p7 = scmp.ne.s32.totalorder %s5397_s13, %s4205_s27  ;;  %p4210_p12 = scmp.lt.s32.totalorder %s5397_s13, %s5444_s4 }
 0x2d0   : > { %p4211_p13 = scmp.lt.s32.totalorder %s4209_s30, %s4205_s27 }
 0x2d1   : > { %p4207_p10 = pnand %p4206_p7, %p4321_p6 }
 0x2d2   : > { %p4212_p0 = por %p4211_p13, %p4210_p12 }
 0x2d3   : > { %p4208_p11 = pneg %p4207_p10 }
 0x2d5   : > { %p4213_p1 = pnand %p4212_p0, %p4208_p11 }
 0x2d7   : > { %4216 = shalt.err (!%p4213_p1)
}
 0x2d8   : > { %s4255_s7 = smov 128   ;;  %s4256_s10 = smov 256  }
 0x2d9   : > { %s4257_s11 = smov 8  }
 0x2da   : > { %4045 = dma.vmem_to_hbm [thread:$0]  (%p4321_p6), %s5392_s9, 384, %s5397_s13, %s3038_s14, %s4255_s7, %s4256_s10, %s4257_s11  }
 0x2db PF: > { %s3065_s12 = sand.u32 1, %s4239_s15   ;;  %p4048_p2 = pnand %p3120_p9, %p4325_p8 }
 0x2dc   : > { %s3066_s20 = scalar_lea.sflag [#allocation5], %s3065_s12 }
 0x2dd   : > { %p4049_p3 = pneg %p4048_p2 }
 0x2df   : > { %4234 = dma.done.wait (%p4049_p3), %s3066_s20, 384  }
 0x2e0   : > { %4236 = vsyncadd (%p4049_p3), %s3066_s20, 4294966912  ;;  %p14_p4 = scmp.ge.s32.totalorder %s4306_s21, 4   ;;  %s5634_s15 = smov %s4243_s16 }
 0x2e1   : > { %s5635_s16 = smov %s4247_s17  ;;  %s5636_s17 = smov %s4319_s24 }
 0x2e2   : > { %s5637_s18 = smov %s4306_s21  ;;  %16 = sbr.rel (!%p14_p4) target bundleno = 3 (0x3), region = 114 }
 0x2e7   :  { %3071 = vsyncpa [#allocation5], 1 }
 0x2e8   :  { %3073 = vsyncpa [#allocation5 + $0x1], 1 }

</bundles_post_ra>
